<compile_context>
chip_gen: v6e
topology: v6e:2x2x1
jax: 0.10.0
libtpu: 0.0.40
codegen_flags: <defaults>
</compile_context>

<pallas_src>
import functools

import jax
import jax.numpy as jnp
from jax import lax
from jax.experimental import pallas as pl
from jax.experimental.pallas import tpu as pltpu

N_MID = 6      # 1x1 Conv2dBlocks between the 4x4/s4 stem and the final 1x1 conv
ALIGN = 256    # pixel-tile alignment: MXU result width (v6e/v7x), 2x v5e lanes


def _encoder_kernel(x_ref, wf_ref, bf_ref, wm_ref, bm_ref, wl_ref, bl_ref, o_ref):
    # x_ref: (tm, K) bf16 patchified pixels (pixel-major).  The large activation
    # tile streams through the MXU as the LHS while the tiny weights are the
    # stationary pushed RHS, so each layer's weight registers load once per tile.
    h = jnp.dot(x_ref[...], wf_ref[...], preferred_element_type=jnp.float32)
    h = jnp.maximum(h + bf_ref[...], 0.0)                     # stem Conv2dBlock + ReLU
    for i in range(N_MID):                                    # static unroll: 1x1 convs
        h = jnp.dot(h.astype(jnp.bfloat16), wm_ref[i],
                    preferred_element_type=jnp.float32)
        h = jnp.maximum(h + bm_ref[i], 0.0)
    # TODO(synk): fold biases into the matmuls (ones-column augmentation) if bundle
    # dumps show VALU became the critical slot after the MXU-orientation flip.
    y = jnp.dot(h.astype(jnp.bfloat16), wl_ref[...],
                preferred_element_type=jnp.float32) + bl_ref[...]
    # log_softmax over the vocab (lane) axis, independently per pixel row.
    m = jnp.max(y, axis=-1, keepdims=True)
    s = y - m
    lse = jnp.log(jnp.sum(jnp.exp(s), axis=-1, keepdims=True))
    # TODO(synk): optionally add a (tm,V)->(V,tm) XLU transpose for a lane-dense
    # store and/or emit bf16 log-probs to halve output HBM traffic if the consumer
    # tolerates it; the masked (tm,16) stores currently hide under MXU/VALU slack.
    o_ref[...] = s - lse


def _choose_tile(M, tm_max, align=ALIGN, min_steps=4):
    """Pick a 256-aligned pixel-row tile.

    When M is large enough, keep >= min_steps grid steps (>= 2 per TensorCore on
    v7x) and prefer an even step count so both cores stay busy and the (tm, K)
    input DMA overlaps compute; otherwise a single tile covers M.
    """
    Mp0 = pl.cdiv(M, align) * align
    tm = min(tm_max, Mp0)
    if Mp0 >= min_steps * align:
        tm = min(tm, align * max(1, Mp0 // (min_steps * align)))
    tm = max(align, (tm // align) * align)
    steps = pl.cdiv(M, tm)
    if steps > 2 and steps % 2 == 1:          # best-effort 2-TC balance (v7x)
        alt_tm = max(align, align * pl.cdiv(pl.cdiv(M, steps + 1), align))
        if pl.cdiv(M, alt_tm) % 2 == 0:
            tm = alt_tm
            steps = pl.cdiv(M, alt_tm)
    return tm, steps


@functools.partial(jax.jit, static_argnames=("tm_max",))
def encoder_bn_forward(x, params, tm_max=2048):
    B, L, C, H, W = x.shape
    Hp, Wp = H // 4, W // 4
    N = B * L
    M = N * Hp * Wp
    K = C * 16

    wf, bf, wm, bm, wl, bl = params
    S = wf.shape[1]
    V = wl.shape[1]

    # Patchify to pixel-major (M, K): row = pixel (n, hp, wp), col = (c, kh, kw).
    # Single fused transpose+cast producer; no separate pad copy (ragged last tile
    # is handled by Pallas block clipping).
    # TODO(synk): move this 4x4 patch gather into the kernel (index_map / manual DMA
    # over the raw NCHW layout) to drop the extra HBM pass; kept in the wrapper for
    # robust lowering at small C and spatial sizes.
    xp = x.reshape(N, C, Hp, 4, Wp, 4).transpose(0, 2, 4, 1, 3, 5).reshape(M, K)
    xp = xp.astype(jnp.bfloat16)

    tm, steps = _choose_tile(M, tm_max)

    out = pl.pallas_call(
        _encoder_kernel,
        out_shape=jax.ShapeDtypeStruct((M, V), jnp.float32),
        grid_spec=pltpu.PrefetchScalarGridSpec(
            num_scalar_prefetch=0,
            grid=(steps,),
            in_specs=[
                pl.BlockSpec((tm, K), lambda i: (i, 0)),
                # Grid-invariant weight/bias blocks: VMEM-resident across steps.
                pl.BlockSpec((K, S), lambda i: (0, 0)),
                pl.BlockSpec((1, S), lambda i: (0, 0)),
                pl.BlockSpec((N_MID, S, S), lambda i: (0, 0, 0)),
                pl.BlockSpec((N_MID, 1, S), lambda i: (0, 0, 0)),
                pl.BlockSpec((S, V), lambda i: (0, 0)),
                pl.BlockSpec((1, V), lambda i: (0, 0)),
            ],
            out_specs=pl.BlockSpec((tm, V), lambda i: (i, 0)),
        ),
        compiler_params=pltpu.CompilerParams(
            dimension_semantics=("parallel",),
            vmem_limit_bytes=32 * 1024 * 1024),
    )(xp, wf, bf, wm, bm, wl, bl)

    # (M, V) pixel-major -> (B, L, V, Hp, Wp) NCHW epilogue.
    out = out.reshape(N, Hp, Wp, V).transpose(0, 3, 1, 2)
    return out.reshape(B, L, V, Hp, Wp)


def init_params(key, in_channels, stem_channels, vocab_size):
    """Deterministic xavier-uniform-style init matching the PyTorch module's shapes."""
    keys = jax.random.split(key, 8)

    def xavier(k, shape, fan_in, fan_out):
        bound = (6.0 / (fan_in + fan_out)) ** 0.5
        return jax.random.uniform(k, shape, jnp.float32, -bound, bound)

    # Stem conv: PyTorch layout (O, I, 4, 4); fan_in = I*16, fan_out = O*16.
    w0 = xavier(keys[0], (stem_channels, in_channels, 4, 4),
                in_channels * 16, stem_channels * 16)
    b0 = jnp.zeros((stem_channels,), jnp.float32)

    mids = []
    for i in range(N_MID):
        wi = xavier(keys[1 + i], (stem_channels, stem_channels, 1, 1),
                    stem_channels, stem_channels)
        mids.append((wi, jnp.zeros((stem_channels,), jnp.float32)))

    wlast = xavier(keys[7], (vocab_size, stem_channels, 1, 1),
                   stem_channels, vocab_size)
    blast = jnp.zeros((vocab_size,), jnp.float32)

    # Kernel layout: pixel-major matmuls (weights transposed so they sit as the
    # stationary MXU RHS), bf16 weights, f32 biases as row vectors.
    wf = w0.reshape(stem_channels, in_channels * 16).T.astype(jnp.bfloat16)   # (K, S)
    bf = b0.reshape(1, stem_channels)                                         # (1, S)
    wm = jnp.stack([w.reshape(stem_channels, stem_channels).T for w, _ in mids]
                   ).astype(jnp.bfloat16)                                     # (6, S, S)
    bm = jnp.stack([b.reshape(1, stem_channels) for _, b in mids])            # (6, 1, S)
    wl = wlast.reshape(vocab_size, stem_channels).T.astype(jnp.bfloat16)      # (S, V)
    bl = blast.reshape(1, vocab_size)                                         # (1, V)

    kernel_params = (wf, bf, wm, bm, wl, bl)
    conv_params = ((w0, b0), mids, (wlast, blast))
    return kernel_params, conv_params


def reference_forward(x, conv_params):
    """Pure-JAX NCHW reference mirroring the PyTorch forward, with the same bf16
    operand rounding (f32 accumulation) that the kernel uses."""
    def bf(z):
        return z.astype(jnp.bfloat16).astype(jnp.float32)

    B, L, C, H, W = x.shape
    xf = bf(x.reshape(B * L, C, H, W))
    (w0, b0), mids, (wl, bl) = conv_params
    dn = ('NCHW', 'OIHW', 'NCHW')
    h = lax.conv_general_dilated(xf, bf(w0), (4, 4), 'VALID', dimension_numbers=dn,
                                 precision=lax.Precision.HIGHEST)
    h = jax.nn.relu(h + b0[None, :, None, None])
    for wi, bi in mids:
        h = lax.conv_general_dilated(bf(h), bf(wi), (1, 1), 'VALID',
                                     dimension_numbers=dn,
                                     precision=lax.Precision.HIGHEST)
        h = jax.nn.relu(h + bi[None, :, None, None])
    y = lax.conv_general_dilated(bf(h), bf(wl), (1, 1), 'VALID',
                                 dimension_numbers=dn,
                                 precision=lax.Precision.HIGHEST)
    y = y + bl[None, :, None, None]
    y = jax.nn.log_softmax(y, axis=1)
    V = y.shape[1]
    return y.reshape(B, L, V, H // 4, W // 4)


if __name__ == "__main__":
    B, L = 2, 3
    in_channels = 3
    stem_channels = 32
    vocab_size = 16
    H = W = 16

    key = jax.random.PRNGKey(0)
    kx, kp = jax.random.split(key)
    x = jax.random.normal(kx, (B, L, in_channels, H, W), dtype=jnp.float32)

    kernel_params, conv_params = init_params(kp, in_channels, stem_channels, vocab_size)

    out = jax.block_until_ready(encoder_bn_forward(x, kernel_params))
    ref = jax.block_until_ready(reference_forward(x, conv_params))

    assert out.shape == (B, L, vocab_size, H // 4, W // 4), out.shape
    max_err = float(jnp.max(jnp.abs(out - ref)))
    # bf16 operands -> compare against a bf16-rounded reference with a loosened tolerance.
    assert jnp.allclose(out, ref, atol=1e-2, rtol=1e-2), max_err

    print("KERNEL_OK")
</pallas_src>

<mosaic_0001>
module attributes {stable_mosaic.version = 11 : i64} {
  func.func @_encoder_kernel(%arg0: i32, %arg1: memref<256x48xbf16, #tpu.memory_space<vmem>>, %arg2: memref<48x32xbf16, #tpu.memory_space<vmem>>, %arg3: memref<1x32xf32, #tpu.memory_space<vmem>>, %arg4: memref<6x32x32xbf16, #tpu.memory_space<vmem>>, %arg5: memref<6x1x32xf32, #tpu.memory_space<vmem>>, %arg6: memref<32x16xbf16, #tpu.memory_space<vmem>>, %arg7: memref<1x16xf32, #tpu.memory_space<vmem>>, %arg8: memref<256x16xf32, #tpu.memory_space<vmem>>) attributes {dimension_semantics = [#tpu.dimension_semantics<parallel>], iteration_bounds = array<i64: 1>, scalar_prefetch = 0 : i64, scratch_operands = 0 : i64, tpu.core_type = #tpu.core_type<tc>, window_params = [{transform_indices = @transform_0, window_bounds = array<i64: 256, 48>}, {pipeline_mode = #tpu.pipeline_mode<synchronous>, transform_indices = @transform_1, window_bounds = array<i64: 48, 32>}, {pipeline_mode = #tpu.pipeline_mode<synchronous>, transform_indices = @transform_2, window_bounds = array<i64: 1, 32>}, {pipeline_mode = #tpu.pipeline_mode<synchronous>, transform_indices = @transform_3, window_bounds = array<i64: 6, 32, 32>}, {pipeline_mode = #tpu.pipeline_mode<synchronous>, transform_indices = @transform_4, window_bounds = array<i64: 6, 1, 32>}, {pipeline_mode = #tpu.pipeline_mode<synchronous>, transform_indices = @transform_5, window_bounds = array<i64: 32, 16>}, {pipeline_mode = #tpu.pipeline_mode<synchronous>, transform_indices = @transform_6, window_bounds = array<i64: 1, 16>}, {transform_indices = @transform_7, window_bounds = array<i64: 256, 16>}]} {
    %c0 = arith.constant 0 : index
    %c0_0 = arith.constant 0 : index
    %0 = vector.load %arg1[%c0, %c0_0] : memref<256x48xbf16, #tpu.memory_space<vmem>>, vector<256x48xbf16>
    %c0_1 = arith.constant 0 : index
    %c0_2 = arith.constant 0 : index
    %1 = vector.load %arg2[%c0_1, %c0_2] : memref<48x32xbf16, #tpu.memory_space<vmem>>, vector<48x32xbf16>
    %cst = arith.constant dense<0.000000e+00> : vector<256x32xf32>
    %2 = tpu.matmul %0, %1, %cst {dimension_numbers = #tpu.dot_dimension_numbers<[1], [0], [0], [1], [0, 0, 1, 1], [], []>} : vector<256x48xbf16>, vector<48x32xbf16>, vector<256x32xf32> -> vector<256x32xf32>
    %c0_3 = arith.constant 0 : index
    %c0_4 = arith.constant 0 : index
    %3 = vector.load %arg3[%c0_3, %c0_4] : memref<1x32xf32, #tpu.memory_space<vmem>>, vector<1x32xf32>
    %4 = vector.broadcast %3 : vector<1x32xf32> to vector<256x32xf32>
    %5 = arith.addf %2, %4 : vector<256x32xf32>
    %cst_5 = arith.constant 0.000000e+00 : f32
    %6 = vector.broadcast %cst_5 : f32 to vector<256x32xf32>
    %7 = arith.maximumf %5, %6 : vector<256x32xf32>
    %8 = arith.truncf %7 : vector<256x32xf32> to vector<256x32xbf16>
    %c0_6 = arith.constant 0 : index
    %c0_7 = arith.constant 0 : index
    %c0_8 = arith.constant 0 : index
    %9 = vector.load %arg4[%c0_6, %c0_7, %c0_8] : memref<6x32x32xbf16, #tpu.memory_space<vmem>>, vector<1x32x32xbf16>
    %10 = vector.shape_cast %9 : vector<1x32x32xbf16> to vector<32x32xbf16>
    %cst_9 = arith.constant dense<0.000000e+00> : vector<256x32xf32>
    %11 = tpu.matmul %8, %10, %cst_9 {dimension_numbers = #tpu.dot_dimension_numbers<[1], [0], [0], [1], [0, 0, 1, 1], [], []>} : vector<256x32xbf16>, vector<32x32xbf16>, vector<256x32xf32> -> vector<256x32xf32>
    %c0_10 = arith.constant 0 : index
    %c0_11 = arith.constant 0 : index
    %c0_12 = arith.constant 0 : index
    %12 = vector.load %arg5[%c0_10, %c0_11, %c0_12] : memref<6x1x32xf32, #tpu.memory_space<vmem>>, vector<1x1x32xf32>
    %13 = vector.shape_cast %12 : vector<1x1x32xf32> to vector<1x32xf32>
    %14 = vector.broadcast %13 : vector<1x32xf32> to vector<256x32xf32>
    %15 = arith.addf %11, %14 : vector<256x32xf32>
    %cst_13 = arith.constant 0.000000e+00 : f32
    %16 = vector.broadcast %cst_13 : f32 to vector<256x32xf32>
    %17 = arith.maximumf %15, %16 : vector<256x32xf32>
    %18 = arith.truncf %17 : vector<256x32xf32> to vector<256x32xbf16>
    %c1 = arith.constant 1 : index
    %c0_14 = arith.constant 0 : index
    %c0_15 = arith.constant 0 : index
    %19 = vector.load %arg4[%c1, %c0_14, %c0_15] : memref<6x32x32xbf16, #tpu.memory_space<vmem>>, vector<1x32x32xbf16>
    %20 = vector.shape_cast %19 : vector<1x32x32xbf16> to vector<32x32xbf16>
    %cst_16 = arith.constant dense<0.000000e+00> : vector<256x32xf32>
    %21 = tpu.matmul %18, %20, %cst_16 {dimension_numbers = #tpu.dot_dimension_numbers<[1], [0], [0], [1], [0, 0, 1, 1], [], []>} : vector<256x32xbf16>, vector<32x32xbf16>, vector<256x32xf32> -> vector<256x32xf32>
    %c1_17 = arith.constant 1 : index
    %c0_18 = arith.constant 0 : index
    %c0_19 = arith.constant 0 : index
    %22 = vector.load %arg5[%c1_17, %c0_18, %c0_19] : memref<6x1x32xf32, #tpu.memory_space<vmem>>, vector<1x1x32xf32>
    %23 = vector.shape_cast %22 : vector<1x1x32xf32> to vector<1x32xf32>
    %24 = vector.broadcast %23 : vector<1x32xf32> to vector<256x32xf32>
    %25 = arith.addf %21, %24 : vector<256x32xf32>
    %cst_20 = arith.constant 0.000000e+00 : f32
    %26 = vector.broadcast %cst_20 : f32 to vector<256x32xf32>
    %27 = arith.maximumf %25, %26 : vector<256x32xf32>
    %28 = arith.truncf %27 : vector<256x32xf32> to vector<256x32xbf16>
    %c2 = arith.constant 2 : index
    %c0_21 = arith.constant 0 : index
    %c0_22 = arith.constant 0 : index
    %29 = vector.load %arg4[%c2, %c0_21, %c0_22] : memref<6x32x32xbf16, #tpu.memory_space<vmem>>, vector<1x32x32xbf16>
    %30 = vector.shape_cast %29 : vector<1x32x32xbf16> to vector<32x32xbf16>
    %cst_23 = arith.constant dense<0.000000e+00> : vector<256x32xf32>
    %31 = tpu.matmul %28, %30, %cst_23 {dimension_numbers = #tpu.dot_dimension_numbers<[1], [0], [0], [1], [0, 0, 1, 1], [], []>} : vector<256x32xbf16>, vector<32x32xbf16>, vector<256x32xf32> -> vector<256x32xf32>
    %c2_24 = arith.constant 2 : index
    %c0_25 = arith.constant 0 : index
    %c0_26 = arith.constant 0 : index
    %32 = vector.load %arg5[%c2_24, %c0_25, %c0_26] : memref<6x1x32xf32, #tpu.memory_space<vmem>>, vector<1x1x32xf32>
    %33 = vector.shape_cast %32 : vector<1x1x32xf32> to vector<1x32xf32>
    %34 = vector.broadcast %33 : vector<1x32xf32> to vector<256x32xf32>
    %35 = arith.addf %31, %34 : vector<256x32xf32>
    %cst_27 = arith.constant 0.000000e+00 : f32
    %36 = vector.broadcast %cst_27 : f32 to vector<256x32xf32>
    %37 = arith.maximumf %35, %36 : vector<256x32xf32>
    %38 = arith.truncf %37 : vector<256x32xf32> to vector<256x32xbf16>
    %c3 = arith.constant 3 : index
    %c0_28 = arith.constant 0 : index
    %c0_29 = arith.constant 0 : index
    %39 = vector.load %arg4[%c3, %c0_28, %c0_29] : memref<6x32x32xbf16, #tpu.memory_space<vmem>>, vector<1x32x32xbf16>
    %40 = vector.shape_cast %39 : vector<1x32x32xbf16> to vector<32x32xbf16>
    %cst_30 = arith.constant dense<0.000000e+00> : vector<256x32xf32>
    %41 = tpu.matmul %38, %40, %cst_30 {dimension_numbers = #tpu.dot_dimension_numbers<[1], [0], [0], [1], [0, 0, 1, 1], [], []>} : vector<256x32xbf16>, vector<32x32xbf16>, vector<256x32xf32> -> vector<256x32xf32>
    %c3_31 = arith.constant 3 : index
    %c0_32 = arith.constant 0 : index
    %c0_33 = arith.constant 0 : index
    %42 = vector.load %arg5[%c3_31, %c0_32, %c0_33] : memref<6x1x32xf32, #tpu.memory_space<vmem>>, vector<1x1x32xf32>
    %43 = vector.shape_cast %42 : vector<1x1x32xf32> to vector<1x32xf32>
    %44 = vector.broadcast %43 : vector<1x32xf32> to vector<256x32xf32>
    %45 = arith.addf %41, %44 : vector<256x32xf32>
    %cst_34 = arith.constant 0.000000e+00 : f32
    %46 = vector.broadcast %cst_34 : f32 to vector<256x32xf32>
    %47 = arith.maximumf %45, %46 : vector<256x32xf32>
    %48 = arith.truncf %47 : vector<256x32xf32> to vector<256x32xbf16>
    %c4 = arith.constant 4 : index
    %c0_35 = arith.constant 0 : index
    %c0_36 = arith.constant 0 : index
    %49 = vector.load %arg4[%c4, %c0_35, %c0_36] : memref<6x32x32xbf16, #tpu.memory_space<vmem>>, vector<1x32x32xbf16>
    %50 = vector.shape_cast %49 : vector<1x32x32xbf16> to vector<32x32xbf16>
    %cst_37 = arith.constant dense<0.000000e+00> : vector<256x32xf32>
    %51 = tpu.matmul %48, %50, %cst_37 {dimension_numbers = #tpu.dot_dimension_numbers<[1], [0], [0], [1], [0, 0, 1, 1], [], []>} : vector<256x32xbf16>, vector<32x32xbf16>, vector<256x32xf32> -> vector<256x32xf32>
    %c4_38 = arith.constant 4 : index
    %c0_39 = arith.constant 0 : index
    %c0_40 = arith.constant 0 : index
    %52 = vector.load %arg5[%c4_38, %c0_39, %c0_40] : memref<6x1x32xf32, #tpu.memory_space<vmem>>, vector<1x1x32xf32>
    %53 = vector.shape_cast %52 : vector<1x1x32xf32> to vector<1x32xf32>
    %54 = vector.broadcast %53 : vector<1x32xf32> to vector<256x32xf32>
    %55 = arith.addf %51, %54 : vector<256x32xf32>
    %cst_41 = arith.constant 0.000000e+00 : f32
    %56 = vector.broadcast %cst_41 : f32 to vector<256x32xf32>
    %57 = arith.maximumf %55, %56 : vector<256x32xf32>
    %58 = arith.truncf %57 : vector<256x32xf32> to vector<256x32xbf16>
    %c5 = arith.constant 5 : index
    %c0_42 = arith.constant 0 : index
    %c0_43 = arith.constant 0 : index
    %59 = vector.load %arg4[%c5, %c0_42, %c0_43] : memref<6x32x32xbf16, #tpu.memory_space<vmem>>, vector<1x32x32xbf16>
    %60 = vector.shape_cast %59 : vector<1x32x32xbf16> to vector<32x32xbf16>
    %cst_44 = arith.constant dense<0.000000e+00> : vector<256x32xf32>
    %61 = tpu.matmul %58, %60, %cst_44 {dimension_numbers = #tpu.dot_dimension_numbers<[1], [0], [0], [1], [0, 0, 1, 1], [], []>} : vector<256x32xbf16>, vector<32x32xbf16>, vector<256x32xf32> -> vector<256x32xf32>
    %c5_45 = arith.constant 5 : index
    %c0_46 = arith.constant 0 : index
    %c0_47 = arith.constant 0 : index
    %62 = vector.load %arg5[%c5_45, %c0_46, %c0_47] : memref<6x1x32xf32, #tpu.memory_space<vmem>>, vector<1x1x32xf32>
    %63 = vector.shape_cast %62 : vector<1x1x32xf32> to vector<1x32xf32>
    %64 = vector.broadcast %63 : vector<1x32xf32> to vector<256x32xf32>
    %65 = arith.addf %61, %64 : vector<256x32xf32>
    %cst_48 = arith.constant 0.000000e+00 : f32
    %66 = vector.broadcast %cst_48 : f32 to vector<256x32xf32>
    %67 = arith.maximumf %65, %66 : vector<256x32xf32>
    %68 = arith.truncf %67 : vector<256x32xf32> to vector<256x32xbf16>
    %c0_49 = arith.constant 0 : index
    %c0_50 = arith.constant 0 : index
    %69 = vector.load %arg6[%c0_49, %c0_50] : memref<32x16xbf16, #tpu.memory_space<vmem>>, vector<32x16xbf16>
    %cst_51 = arith.constant dense<0.000000e+00> : vector<256x16xf32>
    %70 = tpu.matmul %68, %69, %cst_51 {dimension_numbers = #tpu.dot_dimension_numbers<[1], [0], [0], [1], [0, 0, 1, 1], [], []>} : vector<256x32xbf16>, vector<32x16xbf16>, vector<256x16xf32> -> vector<256x16xf32>
    %c0_52 = arith.constant 0 : index
    %c0_53 = arith.constant 0 : index
    %71 = vector.load %arg7[%c0_52, %c0_53] : memref<1x16xf32, #tpu.memory_space<vmem>>, vector<1x16xf32>
    %72 = vector.broadcast %71 : vector<1x16xf32> to vector<256x16xf32>
    %73 = arith.addf %70, %72 : vector<256x16xf32>
    %cst_54 = arith.constant dense<0xFF800000> : vector<256xf32>
    %74 = vector.multi_reduction <maximumf>, %73, %cst_54 [1] : vector<256x16xf32> to vector<256xf32>
    %75 = vector.shape_cast %74 : vector<256xf32> to vector<256x1xf32>
    %76 = vector.broadcast %75 : vector<256x1xf32> to vector<256x16xf32>
    %77 = arith.subf %73, %76 : vector<256x16xf32>
    %78 = math.exp %77 : vector<256x16xf32>
    %cst_55 = arith.constant dense<0.000000e+00> : vector<256xf32>
    %79 = vector.multi_reduction <add>, %78, %cst_55 [1] : vector<256x16xf32> to vector<256xf32>
    %80 = vector.shape_cast %79 : vector<256xf32> to vector<256x1xf32>
    %81 = math.log %80 : vector<256x1xf32>
    %82 = vector.broadcast %81 : vector<256x1xf32> to vector<256x16xf32>
    %83 = arith.subf %77, %82 : vector<256x16xf32>
    %c0_56 = arith.constant 0 : index
    %c0_57 = arith.constant 0 : index
    %84 = vector.load %arg8[%c0_56, %c0_57] : memref<256x16xf32, #tpu.memory_space<vmem>>, vector<256x16xf32>
    tpu.vector_store %arg8[%c0_56, %c0_57], %83 {strides = array<i32>} : memref<256x16xf32, #tpu.memory_space<vmem>>, vector<256x16xf32>,
    return
  }
  func.func @transform_0(%arg0: i32) -> (i32, i32) {
    %c0_i32 = arith.constant 0 : i32
    %c0_i32_0 = arith.constant 0 : i32
    return %arg0, %c0_i32 : i32, i32
  }
  func.func @transform_1(%arg0: i32) -> (i32, i32) {
    %c0_i32 = arith.constant 0 : i32
    %c0_i32_0 = arith.constant 0 : i32
    %c0_i32_1 = arith.constant 0 : i32
    return %c0_i32, %c0_i32_0 : i32, i32
  }
  func.func @transform_2(%arg0: i32) -> (i32, i32) {
    %c0_i32 = arith.constant 0 : i32
    %c0_i32_0 = arith.constant 0 : i32
    %c0_i32_1 = arith.constant 0 : i32
    return %c0_i32, %c0_i32_0 : i32, i32
  }
  func.func @transform_3(%arg0: i32) -> (i32, i32, i32) {
    %c0_i32 = arith.constant 0 : i32
    %c0_i32_0 = arith.constant 0 : i32
    %c0_i32_1 = arith.constant 0 : i32
    %c0_i32_2 = arith.constant 0 : i32
    return %c0_i32, %c0_i32_0, %c0_i32_1 : i32, i32, i32
  }
  func.func @transform_4(%arg0: i32) -> (i32, i32, i32) {
    %c0_i32 = arith.constant 0 : i32
    %c0_i32_0 = arith.constant 0 : i32
    %c0_i32_1 = arith.constant 0 : i32
    %c0_i32_2 = arith.constant 0 : i32
    return %c0_i32, %c0_i32_0, %c0_i32_1 : i32, i32, i32
  }
  func.func @transform_5(%arg0: i32) -> (i32, i32) {
    %c0_i32 = arith.constant 0 : i32
    %c0_i32_0 = arith.constant 0 : i32
    %c0_i32_1 = arith.constant 0 : i32
    return %c0_i32, %c0_i32_0 : i32, i32
  }
  func.func @transform_6(%arg0: i32) -> (i32, i32) {
    %c0_i32 = arith.constant 0 : i32
    %c0_i32_0 = arith.constant 0 : i32
    %c0_i32_1 = arith.constant 0 : i32
    return %c0_i32, %c0_i32_0 : i32, i32
  }
  func.func @transform_7(%arg0: i32) -> (i32, i32) {
    %c0_i32 = arith.constant 0 : i32
    %c0_i32_0 = arith.constant 0 : i32
    return %arg0, %c0_i32 : i32, i32
  }
}

</mosaic_0001>

<bundles_post_ra>
// kernel: encoder_bn_forward.1
= control target key start
LH: loop header
LB: loop body
LE: loop exit
PB: predicated region body
PF: predicated region fallthrough
CT: control target
= control target key end

     0   :  { %12 = vsyncpa [#allocation3], 0  ;;  %vm171_vm0 = vcmask 392192   ;;  %vm452_vm1 = vcmask 261120   ;;  %vm2352_vm2 = vcmask 130048   ;;  %s4521_s0 = inlined_call_operand.vmem [shape: bf16[96,48], index: 0, kind: input, shape index: {}]   ;;  %s4522_s1 = inlined_call_operand.vmem [shape: bf16[48,32], index: 1, kind: input, shape index: {}]   ;;  %s4523_s2 = inlined_call_operand.vmem [shape: f32[1,32], index: 2, kind: input, shape index: {}]   ;;  %s4524_s3 = inlined_call_operand.vmem [shape: bf16[6,32,32], index: 3, kind: input, shape index: {}]   ;;  %s4525_s4 = inlined_call_operand.vmem [shape: f32[6,1,32], index: 4, kind: input, shape index: {}]   ;;  %s4526_s5 = inlined_call_operand.vmem [shape: bf16[32,16], index: 5, kind: input, shape index: {}]   ;;  %s4527_s6 = inlined_call_operand.vmem [shape: f32[1,16], index: 6, kind: input, shape index: {}]   ;;  %s4528_s7 = inlined_call_operand.hbm [shape: f32[96,16], index: 7, kind: output, shape index: {}]  }
   0x1   :  { %v3417_v0 = vld [vmem:[%s4522_s1 + $0x10] sm:$0xff]   ;;  %v3418_v1 = vld [vmem:[%s4522_s1 + $0x8] sm:$0xff]   ;;  %v3420_v2 = vld [vmem:[%s4521_s0] sm:$0xff]  }
   0x2   :  { %3124 = vmatprep.subr.bf16.mxu0 %v3417_v0  ;;  %v3419_v3 = vld [vmem:[%s4522_s1] sm:$0xff]   ;;  %3130 = vmatprep.mubr.msk.bf16.mxu0 %vm171_vm0, %v3420_v2  ;;  %v3421_v4 = vld [vmem:[%s4521_s0 + $0x8] sm:$0xff]   ;;  %v3422_v5 = vld [vmem:[%s4521_s0 + $0x10] sm:$0xff]  }
   0x3   :  { %3125 = vmatpush3.bf16.msra.mxu0 %v3417_v0  ;;  %v3423_v6 = vld [vmem:[%s4521_s0 + $0x18] sm:$0xff]   ;;  %v3424_v7 = vld [vmem:[%s4521_s0 + $0x20] sm:$0xff]   ;;  %v3425_v8 = vld [vmem:[%s4521_s0 + $0x28] sm:$0xff]  }
   0x4   :  { %3126 = vmatprep.subr.bf16.mxu0 %v3418_v1  ;;  %v3426_v9 = vld [vmem:[%s4521_s0 + $0x30] sm:$0xff]   ;;  %v3427_v10 = vld [vmem:[%s4521_s0 + $0x38] sm:$0xff]   ;;  %v3428_v11 = vld [vmem:[%s4521_s0 + $0x40] sm:$0xff]  }
   0x5   :  { %v3429_v12 = vld [vmem:[%s4521_s0 + $0x48] sm:$0xff]   ;;  %v3430_v13 = vld [vmem:[%s4521_s0 + $0x50] sm:$0xff]   ;;  %v3431_v14 = vld [vmem:[%s4521_s0 + $0x58] sm:$0xff]  }
   0x6   :  { %v3432_v15 = vld [vmem:[%s4521_s0 + $0x60] sm:$0xff]   ;;  %v3433_v16 = vld [vmem:[%s4521_s0 + $0x68] sm:$0xff]   ;;  %v3434_v17 = vld [vmem:[%s4521_s0 + $0x70] sm:$0xff]  }
   0x7   :  { %3127 = vmatpush3.bf16.msra.mxu0 %v3418_v1  ;;  %v3435_v18 = vld [vmem:[%s4521_s0 + $0x78] sm:$0xff]   ;;  %v3436_v19 = vld [vmem:[%s4524_s3 + $0x8] sm:$0xff]   ;;  %v3437_v20 = vld [vmem:[%s4524_s3] sm:$0xff]  }
   0x8   :  { %3128 = vmatprep.subr.bf16.mxu0 %v3419_v3  ;;  %3162 = vmatprep.subr.bf16.mxu1 %v3436_v19  ;;  %v3438_v21 = vld [vmem:[%s4524_s3 + $0x18] sm:$0xff]   ;;  %v3728_v24 = vld [vmem:[%s4523_s2] ss:$0 sm:$0xff]  ;;  %v3439_v40 = vld [vmem:[%s4524_s3 + $0x10] sm:$0xff]  }
   0x9   :  { %3163 = vmatpush3.bf16.msra.mxu1 %v3436_v19 }
   0xa   :  { %3164 = vmatprep.subr.bf16.mxu1 %v3437_v20 }
   0xb   :  { %3129 = vmatpush3.bf16.msra.mxu0 %v3419_v3 }
   0xd   :  { %3165 = vmatpush3.bf16.msra.mxu1 %v3437_v20 }
   0xe   :  { %3131 = vmatmul.mubr.msk.bf16.vlgmr.msra.gmra.mxu0 %vm171_vm0, %v3421_v4  ;;  %3198 = vmatprep.subr.bf16.mxu1 %v3438_v21 }
   0xf   :  { %3134 = vmatprep.mubr.msk.bf16.mxu0 %vm171_vm0, %v3422_v5 }
  0x16   :  { %3135 = vmatmul.mubr.msk.bf16.gmra.mxu0 %vm171_vm0, %v3423_v6 }
  0x17   :  { %3138 = vmatprep.mubr.msk.bf16.mxu0 %vm171_vm0, %v3424_v7 }
  0x1e   :  { %3139 = vmatmul.mubr.msk.bf16.gmra.mxu0 %vm171_vm0, %v3425_v8 }
  0x1f   :  { %3142 = vmatprep.mubr.msk.bf16.mxu0 %vm171_vm0, %v3426_v9 }
  0x26   :  { %3143 = vmatmul.mubr.msk.bf16.gmra.mxu0 %vm171_vm0, %v3427_v10 }
  0x27   :  { %3146 = vmatprep.mubr.msk.bf16.mxu0 %vm171_vm0, %v3428_v11 }
  0x2e   :  { %3147 = vmatmul.mubr.msk.bf16.gmra.mxu0 %vm171_vm0, %v3429_v12 }
  0x2f   :  { %3150 = vmatprep.mubr.msk.bf16.mxu0 %vm171_vm0, %v3430_v13 }
  0x36   :  { %3151 = vmatmul.mubr.msk.bf16.gmra.mxu0 %vm171_vm0, %v3431_v14 }
  0x37   :  { %3154 = vmatprep.mubr.msk.bf16.mxu0 %vm171_vm0, %v3432_v15 }
  0x3e   :  { %3155 = vmatmul.mubr.msk.bf16.gmra.mxu0 %vm171_vm0, %v3433_v16 }
  0x3f   :  { %3158 = vmatprep.mubr.msk.bf16.mxu0 %vm171_vm0, %v3434_v17 }
  0x46   :  { %3159 = vmatmul.mubr.msk.bf16.gmra.mxu0 %vm171_vm0, %v3435_v18 }
  0xce   :  { %v3132_v22 = vpop.f32.mrf.mxu0 }
  0xcf   :  { %v263_v28 = vadd.f32 %v3132_v22, %v3728_v24 }
  0xd0   :  { %v254_v23 = vpop.f32.mrf.mxu0 }
  0xd1   :  { %v255_v26 = vadd.f32 %v3728_v24, %v254_v23  ;;  %v383_v35 = vmax.f32 %v263_v28, 0.0 }
  0xd2   :  { %v3133_v25 = vpop.f32.mrf.mxu0 }
  0xd3   :  { %v266_v27 = vadd.f32 %v3133_v25, %v3728_v24  ;;  %v381_v33 = vmax.f32 %v255_v26, 0.0 }
  0xd4   :  { %v257_v29 = vpop.f32.mrf.mxu0 }
  0xd5   :  { %v258_v30 = vadd.f32 %v3728_v24, %v257_v29  ;;  %v384_v31 = vmax.f32 %v266_v27, 0.0 }
  0xd6   :  { %v3136_v32 = vpop.f32.mrf.mxu0 }
  0xd7   :  { %v382_v34 = vmax.f32 %v258_v30, 0.0  ;;  %v414_v38 = vpack.c.bf16 %v384_v31, %v383_v35  ;;  %v279_v43 = vadd.f32 %v3136_v32, %v3728_v24 }
  0xd8   :  { %v270_v36 = vpop.f32.mrf.mxu0 }
  0xd9   :  { %v413_v37 = vpack.c.bf16 %v382_v34, %v381_v33  ;;  %v271_v41 = vadd.f32 %v3728_v24, %v270_v36  ;;  %v387_v50 = vmax.f32 %v279_v43, 0.0 }
  0xda   :  { %v3137_v39 = vpop.f32.mrf.mxu0 }
  0xdb   :  { %v282_v42 = vadd.f32 %v3137_v39, %v3728_v24  ;;  %3166 = vmatprep.mubr.msk.bf16.mxu1 %vm452_vm1, %v413_v37  ;;  %v385_v48 = vmax.f32 %v271_v41, 0.0 }
  0xdc   :  { %v273_v44 = vpop.f32.mrf.mxu0  ;;  %3167 = vmatmul.mubr.msk.bf16.vlgmr.msra.gmra.mxu1 %vm452_vm1, %v414_v38 }
  0xdd   :  { %v274_v45 = vadd.f32 %v3728_v24, %v273_v44  ;;  %3199 = vmatpush3.bf16.msra.mxu1 %v3438_v21  ;;  %v388_v46 = vmax.f32 %v282_v42, 0.0 }
  0xde   :  { %v3140_v47 = vpop.f32.mrf.mxu0  ;;  %3200 = vmatprep.subr.bf16.mxu1 %v3439_v40 }
  0xdf   :  { %v386_v49 = vmax.f32 %v274_v45, 0.0  ;;  %v416_v53 = vpack.c.bf16 %v388_v46, %v387_v50  ;;  %v295_v57 = vadd.f32 %v3140_v47, %v3728_v24 }
  0xe0   :  { %v286_v51 = vpop.f32.mrf.mxu0 }
  0xe1   :  { %v415_v52 = vpack.c.bf16 %v386_v49, %v385_v48  ;;  %3201 = vmatpush3.bf16.msra.mxu1 %v3439_v40  ;;  %v287_v55 = vadd.f32 %v3728_v24, %v286_v51  ;;  %v391_v0 = vmax.f32 %v295_v57, 0.0 }
  0xe2   :  { %v3141_v54 = vpop.f32.mrf.mxu0 }
  0xe3   :  { %v298_v56 = vadd.f32 %v3141_v54, %v3728_v24  ;;  %3170 = vmatprep.mubr.msk.bf16.mxu1 %vm452_vm1, %v415_v52  ;;  %v389_v62 = vmax.f32 %v287_v55, 0.0 }
  0xe4   :  { %v289_v58 = vpop.f32.mrf.mxu0  ;;  %3171 = vmatmul.mubr.msk.bf16.gmra.mxu1 %vm452_vm1, %v416_v53 }
  0xe5   :  { %v290_v59 = vadd.f32 %v3728_v24, %v289_v58  ;;  %v392_v60 = vmax.f32 %v298_v56, 0.0 }
  0xe6   :  { %v3144_v61 = vpop.f32.mrf.mxu0 }
  0xe7   :  { %v390_v63 = vmax.f32 %v290_v59, 0.0  ;;  %v418_v3 = vpack.c.bf16 %v392_v60, %v391_v0  ;;  %v311_v7 = vadd.f32 %v3144_v61, %v3728_v24 }
  0xe8   :  { %v302_v1 = vpop.f32.mrf.mxu0 }
  0xe9   :  { %v417_v2 = vpack.c.bf16 %v390_v63, %v389_v62  ;;  %v303_v5 = vadd.f32 %v3728_v24, %v302_v1  ;;  %v395_v14 = vmax.f32 %v311_v7, 0.0 }
  0xea   :  { %v3145_v4 = vpop.f32.mrf.mxu0 }
  0xeb   :  { %v314_v6 = vadd.f32 %v3145_v4, %v3728_v24  ;;  %3174 = vmatprep.mubr.msk.bf16.mxu1 %vm452_vm1, %v417_v2  ;;  %v393_v12 = vmax.f32 %v303_v5, 0.0 }
  0xec   :  { %v305_v8 = vpop.f32.mrf.mxu0  ;;  %3175 = vmatmul.mubr.msk.bf16.gmra.mxu1 %vm452_vm1, %v418_v3 }
  0xed   :  { %v306_v9 = vadd.f32 %v3728_v24, %v305_v8  ;;  %v396_v10 = vmax.f32 %v314_v6, 0.0 }
  0xee   :  { %v3148_v11 = vpop.f32.mrf.mxu0 }
  0xef   :  { %v394_v13 = vmax.f32 %v306_v9, 0.0  ;;  %v420_v17 = vpack.c.bf16 %v396_v10, %v395_v14  ;;  %v327_v21 = vadd.f32 %v3148_v11, %v3728_v24  ;;  %v3440_v9 = vld [vmem:[%s4524_s3 + $0x28] sm:$0xff]   ;;  %v3441_v10 = vld [vmem:[%s4524_s3 + $0x20] sm:$0xff]  }
  0xf0   :  { %v318_v15 = vpop.f32.mrf.mxu0  ;;  %3234 = vmatprep.subr.bf16.mxu0 %v3440_v9 }
  0xf1   :  { %v419_v16 = vpack.c.bf16 %v394_v13, %v393_v12  ;;  %v319_v19 = vadd.f32 %v3728_v24, %v318_v15  ;;  %v399_v29 = vmax.f32 %v327_v21, 0.0  ;;  %3235 = vmatpush3.bf16.msra.mxu0 %v3440_v9  ;;  %v3790_v12 = vld [vmem:[%s4525_s4] ss:$0 sm:$0xff] }
  0xf2   :  { %v3149_v18 = vpop.f32.mrf.mxu0  ;;  %3236 = vmatprep.subr.bf16.mxu0 %v3441_v10 }
  0xf3   :  { %v330_v20 = vadd.f32 %v3149_v18, %v3728_v24  ;;  %3178 = vmatprep.mubr.msk.bf16.mxu1 %vm452_vm1, %v419_v16  ;;  %v397_v27 = vmax.f32 %v319_v19, 0.0 }
  0xf4   :  { %v321_v22 = vpop.f32.mrf.mxu0  ;;  %3179 = vmatmul.mubr.msk.bf16.gmra.mxu1 %vm452_vm1, %v420_v17 }
  0xf5   :  { %v322_v23 = vadd.f32 %v3728_v24, %v321_v22  ;;  %v400_v25 = vmax.f32 %v330_v20, 0.0  ;;  %3237 = vmatpush3.bf16.msra.mxu0 %v3441_v10 }
  0xf6   :  { %v3152_v26 = vpop.f32.mrf.mxu0 }
  0xf7   :  { %v398_v28 = vmax.f32 %v322_v23, 0.0  ;;  %v422_v32 = vpack.c.bf16 %v400_v25, %v399_v29  ;;  %v343_v36 = vadd.f32 %v3152_v26, %v3728_v24 }
  0xf8   :  { %v334_v30 = vpop.f32.mrf.mxu0 }
  0xf9   :  { %v421_v31 = vpack.c.bf16 %v398_v28, %v397_v27  ;;  %v335_v34 = vadd.f32 %v3728_v24, %v334_v30  ;;  %v403_v43 = vmax.f32 %v343_v36, 0.0 }
  0xfa   :  { %v3153_v33 = vpop.f32.mrf.mxu0 }
  0xfb   :  { %v346_v35 = vadd.f32 %v3153_v33, %v3728_v24  ;;  %3182 = vmatprep.mubr.msk.bf16.mxu1 %vm452_vm1, %v421_v31  ;;  %v401_v41 = vmax.f32 %v335_v34, 0.0 }
  0xfc   :  { %v337_v37 = vpop.f32.mrf.mxu0  ;;  %3183 = vmatmul.mubr.msk.bf16.gmra.mxu1 %vm452_vm1, %v422_v32 }
  0xfd   :  { %v338_v38 = vadd.f32 %v3728_v24, %v337_v37  ;;  %v404_v39 = vmax.f32 %v346_v35, 0.0 }
  0xfe   :  { %v3156_v40 = vpop.f32.mrf.mxu0 }
  0xff   :  { %v402_v42 = vmax.f32 %v338_v38, 0.0  ;;  %v424_v46 = vpack.c.bf16 %v404_v39, %v403_v43  ;;  %v359_v50 = vadd.f32 %v3156_v40, %v3728_v24 }
 0x100   :  { %v350_v44 = vpop.f32.mrf.mxu0 }
 0x101   :  { %v423_v45 = vpack.c.bf16 %v402_v42, %v401_v41  ;;  %v351_v48 = vadd.f32 %v3728_v24, %v350_v44  ;;  %v407_v57 = vmax.f32 %v359_v50, 0.0 }
 0x102   :  { %v3157_v47 = vpop.f32.mrf.mxu0 }
 0x103   :  { %v362_v49 = vadd.f32 %v3157_v47, %v3728_v24  ;;  %3186 = vmatprep.mubr.msk.bf16.mxu1 %vm452_vm1, %v423_v45  ;;  %v405_v55 = vmax.f32 %v351_v48, 0.0 }
 0x104   :  { %v353_v51 = vpop.f32.mrf.mxu0  ;;  %3187 = vmatmul.mubr.msk.bf16.gmra.mxu1 %vm452_vm1, %v424_v46 }
 0x105   :  { %v354_v52 = vadd.f32 %v3728_v24, %v353_v51  ;;  %v408_v53 = vmax.f32 %v362_v49, 0.0 }
 0x106   :  { %v3160_v54 = vpop.f32.mrf.mxu0 }
 0x107   :  { %v406_v56 = vmax.f32 %v354_v52, 0.0  ;;  %v426_v60 = vpack.c.bf16 %v408_v53, %v407_v57  ;;  %v375_v0 = vadd.f32 %v3160_v54, %v3728_v24 }
 0x108   :  { %v366_v58 = vpop.f32.mrf.mxu0 }
 0x109   :  { %v425_v59 = vpack.c.bf16 %v406_v56, %v405_v55  ;;  %v367_v62 = vadd.f32 %v3728_v24, %v366_v58  ;;  %v411_v6 = vmax.f32 %v375_v0, 0.0 }
 0x10a   :  { %v3161_v61 = vpop.f32.mrf.mxu0 }
 0x10b   :  { %v378_v63 = vadd.f32 %v3161_v61, %v3728_v24  ;;  %3190 = vmatprep.mubr.msk.bf16.mxu1 %vm452_vm1, %v425_v59  ;;  %v409_v4 = vmax.f32 %v367_v62, 0.0 }
 0x10c   :  { %v369_v1 = vpop.f32.mrf.mxu0  ;;  %3191 = vmatmul.mubr.msk.bf16.gmra.mxu1 %vm452_vm1, %v426_v60 }
 0x10d   :  { %v370_v2 = vadd.f32 %v3728_v24, %v369_v1  ;;  %v412_v3 = vmax.f32 %v378_v63, 0.0 }
 0x10f   :  { %v410_v5 = vmax.f32 %v370_v2, 0.0  ;;  %v428_v8 = vpack.c.bf16 %v412_v3, %v411_v6 }
 0x111   :  { %v427_v7 = vpack.c.bf16 %v410_v5, %v409_v4 }
 0x113   :  { %3194 = vmatprep.mubr.msk.bf16.mxu1 %vm452_vm1, %v427_v7 }
 0x114   :  { %3195 = vmatmul.mubr.msk.bf16.gmra.mxu1 %vm452_vm1, %v428_v8 }
 0x19c   :  { %v3168_v24 = vpop.f32.mrf.mxu1 }
 0x19d   :  { %v544_v16 = vadd.f32 %v3168_v24, %v3790_v12 }
 0x19e   :  { %v535_v11 = vpop.f32.mrf.mxu1 }
 0x19f   :  { %v536_v14 = vadd.f32 %v3790_v12, %v535_v11  ;;  %v664_v23 = vmax.f32 %v544_v16, 0.0 }
 0x1a0   :  { %v3169_v13 = vpop.f32.mrf.mxu1 }
 0x1a1   :  { %v547_v15 = vadd.f32 %v3169_v13, %v3790_v12  ;;  %v662_v21 = vmax.f32 %v536_v14, 0.0 }
 0x1a2   :  { %v538_v17 = vpop.f32.mrf.mxu1 }
 0x1a3   :  { %v539_v18 = vadd.f32 %v3790_v12, %v538_v17  ;;  %v665_v19 = vmax.f32 %v547_v15, 0.0 }
 0x1a4   :  { %v3172_v20 = vpop.f32.mrf.mxu1 }
 0x1a5   :  { %v663_v22 = vmax.f32 %v539_v18, 0.0  ;;  %v695_v27 = vpack.c.bf16 %v665_v19, %v664_v23  ;;  %v560_v31 = vadd.f32 %v3172_v20, %v3790_v12 }
 0x1a6   :  { %v551_v25 = vpop.f32.mrf.mxu1 }
 0x1a7   :  { %v694_v26 = vpack.c.bf16 %v663_v22, %v662_v21  ;;  %v552_v29 = vadd.f32 %v3790_v12, %v551_v25  ;;  %v668_v38 = vmax.f32 %v560_v31, 0.0 }
 0x1a8   :  { %v3173_v28 = vpop.f32.mrf.mxu1 }
 0x1a9   :  { %v563_v30 = vadd.f32 %v3173_v28, %v3790_v12  ;;  %3202 = vmatprep.mubr.msk.bf16.mxu1 %vm452_vm1, %v694_v26  ;;  %v666_v36 = vmax.f32 %v552_v29, 0.0 }
 0x1aa   :  { %v554_v32 = vpop.f32.mrf.mxu1  ;;  %3203 = vmatmul.mubr.msk.bf16.vlgmr.msra.gmra.mxu1 %vm452_vm1, %v695_v27 }
 0x1ab   :  { %v555_v33 = vadd.f32 %v3790_v12, %v554_v32  ;;  %v669_v34 = vmax.f32 %v563_v30, 0.0 }
 0x1ac   :  { %v3176_v35 = vpop.f32.mrf.mxu1 }
 0x1ad   :  { %v667_v37 = vmax.f32 %v555_v33, 0.0  ;;  %v697_v41 = vpack.c.bf16 %v669_v34, %v668_v38  ;;  %v576_v45 = vadd.f32 %v3176_v35, %v3790_v12 }
 0x1ae   :  { %v567_v39 = vpop.f32.mrf.mxu1 }
 0x1af   :  { %v696_v40 = vpack.c.bf16 %v667_v37, %v666_v36  ;;  %v568_v43 = vadd.f32 %v3790_v12, %v567_v39  ;;  %v672_v52 = vmax.f32 %v576_v45, 0.0 }
 0x1b0   :  { %v3177_v42 = vpop.f32.mrf.mxu1 }
 0x1b1   :  { %v579_v44 = vadd.f32 %v3177_v42, %v3790_v12  ;;  %3206 = vmatprep.mubr.msk.bf16.mxu1 %vm452_vm1, %v696_v40  ;;  %v670_v50 = vmax.f32 %v568_v43, 0.0 }
 0x1b2   :  { %v570_v46 = vpop.f32.mrf.mxu1  ;;  %3207 = vmatmul.mubr.msk.bf16.gmra.mxu1 %vm452_vm1, %v697_v41 }
 0x1b3   :  { %v571_v47 = vadd.f32 %v3790_v12, %v570_v46  ;;  %v673_v48 = vmax.f32 %v579_v44, 0.0 }
 0x1b4   :  { %v3180_v49 = vpop.f32.mrf.mxu1 }
 0x1b5   :  { %v671_v51 = vmax.f32 %v571_v47, 0.0  ;;  %v699_v55 = vpack.c.bf16 %v673_v48, %v672_v52  ;;  %v592_v59 = vadd.f32 %v3180_v49, %v3790_v12 }
 0x1b6   :  { %v583_v53 = vpop.f32.mrf.mxu1 }
 0x1b7   :  { %v698_v54 = vpack.c.bf16 %v671_v51, %v670_v50  ;;  %v584_v57 = vadd.f32 %v3790_v12, %v583_v53  ;;  %v676_v2 = vmax.f32 %v592_v59, 0.0 }
 0x1b8   :  { %v3181_v56 = vpop.f32.mrf.mxu1 }
 0x1b9   :  { %v595_v58 = vadd.f32 %v3181_v56, %v3790_v12  ;;  %3210 = vmatprep.mubr.msk.bf16.mxu1 %vm452_vm1, %v698_v54  ;;  %v674_v0 = vmax.f32 %v584_v57, 0.0 }
 0x1ba   :  { %v586_v60 = vpop.f32.mrf.mxu1  ;;  %3211 = vmatmul.mubr.msk.bf16.gmra.mxu1 %vm452_vm1, %v699_v55 }
 0x1bb   :  { %v587_v61 = vadd.f32 %v3790_v12, %v586_v60  ;;  %v677_v62 = vmax.f32 %v595_v58, 0.0 }
 0x1bc   :  { %v3184_v63 = vpop.f32.mrf.mxu1 }
 0x1bd   :  { %v675_v1 = vmax.f32 %v587_v61, 0.0  ;;  %v701_v5 = vpack.c.bf16 %v677_v62, %v676_v2  ;;  %v608_v9 = vadd.f32 %v3184_v63, %v3790_v12  ;;  %v3442_v61 = vld [vmem:[%s4524_s3 + $0x38] sm:$0xff]   ;;  %v3443_v62 = vld [vmem:[%s4524_s3 + $0x30] sm:$0xff]  }
 0x1be   :  { %v599_v3 = vpop.f32.mrf.mxu1  ;;  %3270 = vmatprep.subr.bf16.mxu1 %v3442_v61 }
 0x1bf   :  { %v700_v4 = vpack.c.bf16 %v675_v1, %v674_v0  ;;  %v600_v7 = vadd.f32 %v3790_v12, %v599_v3  ;;  %v680_v16 = vmax.f32 %v608_v9, 0.0  ;;  %3271 = vmatpush3.bf16.msra.mxu1 %v3442_v61  ;;  %v3849_v0 = vld [vmem:[%s4525_s4 + $0x1] ss:$0 sm:$0xff] }
 0x1c0   :  { %v3185_v6 = vpop.f32.mrf.mxu1  ;;  %3272 = vmatprep.subr.bf16.mxu1 %v3443_v62 }
 0x1c1   :  { %v611_v8 = vadd.f32 %v3185_v6, %v3790_v12  ;;  %3214 = vmatprep.mubr.msk.bf16.mxu1 %vm452_vm1, %v700_v4  ;;  %v678_v14 = vmax.f32 %v600_v7, 0.0 }
 0x1c2   :  { %v602_v10 = vpop.f32.mrf.mxu1  ;;  %3215 = vmatmul.mubr.msk.bf16.gmra.mxu1 %vm452_vm1, %v701_v5 }
 0x1c3   :  { %v603_v24 = vadd.f32 %v3790_v12, %v602_v10  ;;  %v681_v11 = vmax.f32 %v611_v8, 0.0  ;;  %3273 = vmatpush3.bf16.msra.mxu1 %v3443_v62 }
 0x1c4   :  { %v3188_v13 = vpop.f32.mrf.mxu1 }
 0x1c5   :  { %v679_v15 = vmax.f32 %v603_v24, 0.0  ;;  %v703_v19 = vpack.c.bf16 %v681_v11, %v680_v16  ;;  %v624_v23 = vadd.f32 %v3188_v13, %v3790_v12 }
 0x1c6   :  { %v615_v17 = vpop.f32.mrf.mxu1 }
 0x1c7   :  { %v702_v18 = vpack.c.bf16 %v679_v15, %v678_v14  ;;  %v616_v21 = vadd.f32 %v3790_v12, %v615_v17  ;;  %v684_v31 = vmax.f32 %v624_v23, 0.0 }
 0x1c8   :  { %v3189_v20 = vpop.f32.mrf.mxu1 }
 0x1c9   :  { %v627_v22 = vadd.f32 %v3189_v20, %v3790_v12  ;;  %3218 = vmatprep.mubr.msk.bf16.mxu1 %vm452_vm1, %v702_v18  ;;  %v682_v29 = vmax.f32 %v616_v21, 0.0 }
 0x1ca   :  { %v618_v25 = vpop.f32.mrf.mxu1  ;;  %3219 = vmatmul.mubr.msk.bf16.gmra.mxu1 %vm452_vm1, %v703_v19 }
 0x1cb   :  { %v619_v26 = vadd.f32 %v3790_v12, %v618_v25  ;;  %v685_v27 = vmax.f32 %v627_v22, 0.0 }
 0x1cc   :  { %v3192_v28 = vpop.f32.mrf.mxu1 }
 0x1cd   :  { %v683_v30 = vmax.f32 %v619_v26, 0.0  ;;  %v705_v34 = vpack.c.bf16 %v685_v27, %v684_v31  ;;  %v640_v38 = vadd.f32 %v3192_v28, %v3790_v12 }
 0x1ce   :  { %v631_v32 = vpop.f32.mrf.mxu1 }
 0x1cf   :  { %v704_v33 = vpack.c.bf16 %v683_v30, %v682_v29  ;;  %v632_v36 = vadd.f32 %v3790_v12, %v631_v32  ;;  %v688_v45 = vmax.f32 %v640_v38, 0.0 }
 0x1d0   :  { %v3193_v35 = vpop.f32.mrf.mxu1 }
 0x1d1   :  { %v643_v37 = vadd.f32 %v3193_v35, %v3790_v12  ;;  %3222 = vmatprep.mubr.msk.bf16.mxu1 %vm452_vm1, %v704_v33  ;;  %v686_v43 = vmax.f32 %v632_v36, 0.0 }
 0x1d2   :  { %v634_v39 = vpop.f32.mrf.mxu1  ;;  %3223 = vmatmul.mubr.msk.bf16.gmra.mxu1 %vm452_vm1, %v705_v34 }
 0x1d3   :  { %v635_v40 = vadd.f32 %v3790_v12, %v634_v39  ;;  %v689_v41 = vmax.f32 %v643_v37, 0.0 }
 0x1d4   :  { %v3196_v42 = vpop.f32.mrf.mxu1 }
 0x1d5   :  { %v687_v44 = vmax.f32 %v635_v40, 0.0  ;;  %v707_v48 = vpack.c.bf16 %v689_v41, %v688_v45  ;;  %v656_v52 = vadd.f32 %v3196_v42, %v3790_v12 }
 0x1d6   :  { %v647_v46 = vpop.f32.mrf.mxu1 }
 0x1d7   :  { %v706_v47 = vpack.c.bf16 %v687_v44, %v686_v43  ;;  %v648_v50 = vadd.f32 %v3790_v12, %v647_v46  ;;  %v692_v58 = vmax.f32 %v656_v52, 0.0 }
 0x1d8   :  { %v3197_v49 = vpop.f32.mrf.mxu1 }
 0x1d9   :  { %v659_v51 = vadd.f32 %v3197_v49, %v3790_v12  ;;  %3226 = vmatprep.mubr.msk.bf16.mxu1 %vm452_vm1, %v706_v47  ;;  %v690_v56 = vmax.f32 %v648_v50, 0.0 }
 0x1da   :  { %v650_v53 = vpop.f32.mrf.mxu1  ;;  %3227 = vmatmul.mubr.msk.bf16.gmra.mxu1 %vm452_vm1, %v707_v48 }
 0x1db   :  { %v651_v54 = vadd.f32 %v3790_v12, %v650_v53  ;;  %v693_v55 = vmax.f32 %v659_v51, 0.0 }
 0x1dd   :  { %v691_v57 = vmax.f32 %v651_v54, 0.0  ;;  %v709_v60 = vpack.c.bf16 %v693_v55, %v692_v58 }
 0x1df   :  { %v708_v59 = vpack.c.bf16 %v691_v57, %v690_v56 }
 0x1e1   :  { %3230 = vmatprep.mubr.msk.bf16.mxu1 %vm452_vm1, %v708_v59 }
 0x1e2   :  { %3231 = vmatmul.mubr.msk.bf16.gmra.mxu1 %vm452_vm1, %v709_v60 }
 0x26a   :  { %v3204_v12 = vpop.f32.mrf.mxu1 }
 0x26b   :  { %v826_v4 = vadd.f32 %v3204_v12, %v3849_v0 }
 0x26c   :  { %v817_v63 = vpop.f32.mrf.mxu1 }
 0x26d   :  { %v818_v2 = vadd.f32 %v3849_v0, %v817_v63  ;;  %v946_v24 = vmax.f32 %v826_v4, 0.0 }
 0x26e   :  { %v3205_v1 = vpop.f32.mrf.mxu1 }
 0x26f   :  { %v829_v3 = vadd.f32 %v3205_v1, %v3849_v0  ;;  %v944_v9 = vmax.f32 %v818_v2, 0.0 }
 0x270   :  { %v820_v5 = vpop.f32.mrf.mxu1 }
 0x271   :  { %v821_v6 = vadd.f32 %v3849_v0, %v820_v5  ;;  %v947_v7 = vmax.f32 %v829_v3, 0.0 }
 0x272   :  { %v3208_v8 = vpop.f32.mrf.mxu1 }
 0x273   :  { %v945_v10 = vmax.f32 %v821_v6, 0.0  ;;  %v977_v14 = vpack.c.bf16 %v947_v7, %v946_v24  ;;  %v842_v18 = vadd.f32 %v3208_v8, %v3849_v0 }
 0x274   :  { %v833_v11 = vpop.f32.mrf.mxu1 }
 0x275   :  { %v976_v13 = vpack.c.bf16 %v945_v10, %v944_v9  ;;  %v834_v16 = vadd.f32 %v3849_v0, %v833_v11  ;;  %v950_v26 = vmax.f32 %v842_v18, 0.0 }
 0x276   :  { %v3209_v15 = vpop.f32.mrf.mxu1 }
 0x277   :  { %v845_v17 = vadd.f32 %v3209_v15, %v3849_v0  ;;  %3238 = vmatprep.mubr.msk.bf16.mxu0 %vm452_vm1, %v976_v13  ;;  %v948_v23 = vmax.f32 %v834_v16, 0.0 }
 0x278   :  { %v836_v19 = vpop.f32.mrf.mxu1  ;;  %3239 = vmatmul.mubr.msk.bf16.vlgmr.msra.gmra.mxu0 %vm452_vm1, %v977_v14 }
 0x279   :  { %v837_v20 = vadd.f32 %v3849_v0, %v836_v19  ;;  %v951_v21 = vmax.f32 %v845_v17, 0.0 }
 0x27a   :  { %v3212_v22 = vpop.f32.mrf.mxu1 }
 0x27b   :  { %v949_v25 = vmax.f32 %v837_v20, 0.0  ;;  %v979_v29 = vpack.c.bf16 %v951_v21, %v950_v26  ;;  %v858_v33 = vadd.f32 %v3212_v22, %v3849_v0 }
 0x27c   :  { %v849_v27 = vpop.f32.mrf.mxu1 }
 0x27d   :  { %v978_v28 = vpack.c.bf16 %v949_v25, %v948_v23  ;;  %v850_v31 = vadd.f32 %v3849_v0, %v849_v27  ;;  %v954_v40 = vmax.f32 %v858_v33, 0.0 }
 0x27e   :  { %v3213_v30 = vpop.f32.mrf.mxu1 }
 0x27f   :  { %v861_v32 = vadd.f32 %v3213_v30, %v3849_v0  ;;  %3242 = vmatprep.mubr.msk.bf16.mxu0 %vm452_vm1, %v978_v28  ;;  %v952_v38 = vmax.f32 %v850_v31, 0.0 }
 0x280   :  { %v852_v34 = vpop.f32.mrf.mxu1  ;;  %3243 = vmatmul.mubr.msk.bf16.gmra.mxu0 %vm452_vm1, %v979_v29 }
 0x281   :  { %v853_v35 = vadd.f32 %v3849_v0, %v852_v34  ;;  %v955_v36 = vmax.f32 %v861_v32, 0.0 }
 0x282   :  { %v3216_v37 = vpop.f32.mrf.mxu1 }
 0x283   :  { %v953_v39 = vmax.f32 %v853_v35, 0.0  ;;  %v981_v43 = vpack.c.bf16 %v955_v36, %v954_v40  ;;  %v874_v47 = vadd.f32 %v3216_v37, %v3849_v0 }
 0x284   :  { %v865_v41 = vpop.f32.mrf.mxu1 }
 0x285   :  { %v980_v42 = vpack.c.bf16 %v953_v39, %v952_v38  ;;  %v866_v45 = vadd.f32 %v3849_v0, %v865_v41  ;;  %v958_v54 = vmax.f32 %v874_v47, 0.0 }
 0x286   :  { %v3217_v44 = vpop.f32.mrf.mxu1 }
 0x287   :  { %v877_v46 = vadd.f32 %v3217_v44, %v3849_v0  ;;  %3246 = vmatprep.mubr.msk.bf16.mxu0 %vm452_vm1, %v980_v42  ;;  %v956_v52 = vmax.f32 %v866_v45, 0.0 }
 0x288   :  { %v868_v48 = vpop.f32.mrf.mxu1  ;;  %3247 = vmatmul.mubr.msk.bf16.gmra.mxu0 %vm452_vm1, %v981_v43 }
 0x289   :  { %v869_v49 = vadd.f32 %v3849_v0, %v868_v48  ;;  %v959_v50 = vmax.f32 %v877_v46, 0.0 }
 0x28a   :  { %v3220_v51 = vpop.f32.mrf.mxu1 }
 0x28b   :  { %v957_v53 = vmax.f32 %v869_v49, 0.0  ;;  %v983_v57 = vpack.c.bf16 %v959_v50, %v958_v54  ;;  %v890_v61 = vadd.f32 %v3220_v51, %v3849_v0  ;;  %v3444_v49 = vld [vmem:[%s4524_s3 + $0x48] sm:$0xff]   ;;  %v3445_v50 = vld [vmem:[%s4524_s3 + $0x40] sm:$0xff]  }
 0x28c   :  { %v881_v55 = vpop.f32.mrf.mxu1  ;;  %3306 = vmatprep.subr.bf16.mxu0 %v3444_v49 }
 0x28d   :  { %v982_v56 = vpack.c.bf16 %v957_v53, %v956_v52  ;;  %v882_v59 = vadd.f32 %v3849_v0, %v881_v55  ;;  %v962_v4 = vmax.f32 %v890_v61, 0.0  ;;  %3307 = vmatpush3.bf16.msra.mxu0 %v3444_v49  ;;  %v3908_v52 = vld [vmem:[%s4525_s4 + $0x2] ss:$0 sm:$0xff] }
 0x28e   :  { %v3221_v58 = vpop.f32.mrf.mxu1  ;;  %3308 = vmatprep.subr.bf16.mxu0 %v3445_v50 }
 0x28f   :  { %v893_v60 = vadd.f32 %v3221_v58, %v3849_v0  ;;  %3250 = vmatprep.mubr.msk.bf16.mxu0 %vm452_vm1, %v982_v56  ;;  %v960_v2 = vmax.f32 %v882_v59, 0.0 }
 0x290   :  { %v884_v62 = vpop.f32.mrf.mxu1  ;;  %3251 = vmatmul.mubr.msk.bf16.gmra.mxu0 %vm452_vm1, %v983_v57 }
 0x291   :  { %v885_v12 = vadd.f32 %v3849_v0, %v884_v62  ;;  %v963_v63 = vmax.f32 %v893_v60, 0.0  ;;  %3309 = vmatpush3.bf16.msra.mxu0 %v3445_v50 }
 0x292   :  { %v3224_v1 = vpop.f32.mrf.mxu1 }
 0x293   :  { %v961_v3 = vmax.f32 %v885_v12, 0.0  ;;  %v985_v7 = vpack.c.bf16 %v963_v63, %v962_v4  ;;  %v906_v24 = vadd.f32 %v3224_v1, %v3849_v0 }
 0x294   :  { %v897_v5 = vpop.f32.mrf.mxu1 }
 0x295   :  { %v984_v6 = vpack.c.bf16 %v961_v3, %v960_v2  ;;  %v898_v9 = vadd.f32 %v3849_v0, %v897_v5  ;;  %v966_v18 = vmax.f32 %v906_v24, 0.0 }
 0x296   :  { %v3225_v8 = vpop.f32.mrf.mxu1 }
 0x297   :  { %v909_v10 = vadd.f32 %v3225_v8, %v3849_v0  ;;  %3254 = vmatprep.mubr.msk.bf16.mxu0 %vm452_vm1, %v984_v6  ;;  %v964_v16 = vmax.f32 %v898_v9, 0.0 }
 0x298   :  { %v900_v11 = vpop.f32.mrf.mxu1  ;;  %3255 = vmatmul.mubr.msk.bf16.gmra.mxu0 %vm452_vm1, %v985_v7 }
 0x299   :  { %v901_v13 = vadd.f32 %v3849_v0, %v900_v11  ;;  %v967_v14 = vmax.f32 %v909_v10, 0.0 }
 0x29a   :  { %v3228_v15 = vpop.f32.mrf.mxu1 }
 0x29b   :  { %v965_v17 = vmax.f32 %v901_v13, 0.0  ;;  %v987_v21 = vpack.c.bf16 %v967_v14, %v966_v18  ;;  %v922_v26 = vadd.f32 %v3228_v15, %v3849_v0 }
 0x29c   :  { %v913_v19 = vpop.f32.mrf.mxu1 }
 0x29d   :  { %v986_v20 = vpack.c.bf16 %v965_v17, %v964_v16  ;;  %v914_v23 = vadd.f32 %v3849_v0, %v913_v19  ;;  %v970_v33 = vmax.f32 %v922_v26, 0.0 }
 0x29e   :  { %v3229_v22 = vpop.f32.mrf.mxu1 }
 0x29f   :  { %v925_v25 = vadd.f32 %v3229_v22, %v3849_v0  ;;  %3258 = vmatprep.mubr.msk.bf16.mxu0 %vm452_vm1, %v986_v20  ;;  %v968_v31 = vmax.f32 %v914_v23, 0.0 }
 0x2a0   :  { %v916_v27 = vpop.f32.mrf.mxu1  ;;  %3259 = vmatmul.mubr.msk.bf16.gmra.mxu0 %vm452_vm1, %v987_v21 }
 0x2a1   :  { %v917_v28 = vadd.f32 %v3849_v0, %v916_v27  ;;  %v971_v29 = vmax.f32 %v925_v25, 0.0 }
 0x2a2   :  { %v3232_v30 = vpop.f32.mrf.mxu1 }
 0x2a3   :  { %v969_v32 = vmax.f32 %v917_v28, 0.0  ;;  %v989_v36 = vpack.c.bf16 %v971_v29, %v970_v33  ;;  %v938_v40 = vadd.f32 %v3232_v30, %v3849_v0 }
 0x2a4   :  { %v929_v34 = vpop.f32.mrf.mxu1 }
 0x2a5   :  { %v988_v35 = vpack.c.bf16 %v969_v32, %v968_v31  ;;  %v930_v38 = vadd.f32 %v3849_v0, %v929_v34  ;;  %v974_v46 = vmax.f32 %v938_v40, 0.0 }
 0x2a6   :  { %v3233_v37 = vpop.f32.mrf.mxu1 }
 0x2a7   :  { %v941_v39 = vadd.f32 %v3233_v37, %v3849_v0  ;;  %3262 = vmatprep.mubr.msk.bf16.mxu0 %vm452_vm1, %v988_v35  ;;  %v972_v44 = vmax.f32 %v930_v38, 0.0 }
 0x2a8   :  { %v932_v41 = vpop.f32.mrf.mxu1  ;;  %3263 = vmatmul.mubr.msk.bf16.gmra.mxu0 %vm452_vm1, %v989_v36 }
 0x2a9   :  { %v933_v42 = vadd.f32 %v3849_v0, %v932_v41  ;;  %v975_v43 = vmax.f32 %v941_v39, 0.0 }
 0x2ab   :  { %v973_v45 = vmax.f32 %v933_v42, 0.0  ;;  %v991_v48 = vpack.c.bf16 %v975_v43, %v974_v46 }
 0x2ad   :  { %v990_v47 = vpack.c.bf16 %v973_v45, %v972_v44 }
 0x2af   :  { %3266 = vmatprep.mubr.msk.bf16.mxu0 %vm452_vm1, %v990_v47 }
 0x2b0   :  { %3267 = vmatmul.mubr.msk.bf16.gmra.mxu0 %vm452_vm1, %v991_v48 }
 0x338   :  { %v3240_v0 = vpop.f32.mrf.mxu0 }
 0x339   :  { %v1108_v56 = vadd.f32 %v3240_v0, %v3908_v52 }
 0x33a   :  { %v1099_v51 = vpop.f32.mrf.mxu0 }
 0x33b   :  { %v1100_v54 = vadd.f32 %v3908_v52, %v1099_v51  ;;  %v1228_v12 = vmax.f32 %v1108_v56, 0.0 }
 0x33c   :  { %v3241_v53 = vpop.f32.mrf.mxu0 }
 0x33d   :  { %v1111_v55 = vadd.f32 %v3241_v53, %v3908_v52  ;;  %v1226_v61 = vmax.f32 %v1100_v54, 0.0 }
 0x33e   :  { %v1102_v57 = vpop.f32.mrf.mxu0 }
 0x33f   :  { %v1103_v58 = vadd.f32 %v3908_v52, %v1102_v57  ;;  %v1229_v59 = vmax.f32 %v1111_v55, 0.0 }
 0x340   :  { %v3244_v60 = vpop.f32.mrf.mxu0 }
 0x341   :  { %v1227_v62 = vmax.f32 %v1103_v58, 0.0  ;;  %v1259_v2 = vpack.c.bf16 %v1229_v59, %v1228_v12  ;;  %v1124_v6 = vadd.f32 %v3244_v60, %v3908_v52 }
 0x342   :  { %v1115_v63 = vpop.f32.mrf.mxu0 }
 0x343   :  { %v1258_v1 = vpack.c.bf16 %v1227_v62, %v1226_v61  ;;  %v1116_v4 = vadd.f32 %v3908_v52, %v1115_v63  ;;  %v1232_v13 = vmax.f32 %v1124_v6, 0.0 }
 0x344   :  { %v3245_v3 = vpop.f32.mrf.mxu0 }
 0x345   :  { %v1127_v5 = vadd.f32 %v3245_v3, %v3908_v52  ;;  %3274 = vmatprep.mubr.msk.bf16.mxu1 %vm452_vm1, %v1258_v1  ;;  %v1230_v24 = vmax.f32 %v1116_v4, 0.0 }
 0x346   :  { %v1118_v7 = vpop.f32.mrf.mxu0  ;;  %3275 = vmatmul.mubr.msk.bf16.vlgmr.msra.gmra.mxu1 %vm452_vm1, %v1259_v2 }
 0x347   :  { %v1119_v8 = vadd.f32 %v3908_v52, %v1118_v7  ;;  %v1233_v9 = vmax.f32 %v1127_v5, 0.0 }
 0x348   :  { %v3248_v10 = vpop.f32.mrf.mxu0 }
 0x349   :  { %v1231_v11 = vmax.f32 %v1119_v8, 0.0  ;;  %v1261_v16 = vpack.c.bf16 %v1233_v9, %v1232_v13  ;;  %v1140_v20 = vadd.f32 %v3248_v10, %v3908_v52 }
 0x34a   :  { %v1131_v14 = vpop.f32.mrf.mxu0 }
 0x34b   :  { %v1260_v15 = vpack.c.bf16 %v1231_v11, %v1230_v24  ;;  %v1132_v18 = vadd.f32 %v3908_v52, %v1131_v14  ;;  %v1236_v28 = vmax.f32 %v1140_v20, 0.0 }
 0x34c   :  { %v3249_v17 = vpop.f32.mrf.mxu0 }
 0x34d   :  { %v1143_v19 = vadd.f32 %v3249_v17, %v3908_v52  ;;  %3278 = vmatprep.mubr.msk.bf16.mxu1 %vm452_vm1, %v1260_v15  ;;  %v1234_v26 = vmax.f32 %v1132_v18, 0.0 }
 0x34e   :  { %v1134_v21 = vpop.f32.mrf.mxu0  ;;  %3279 = vmatmul.mubr.msk.bf16.gmra.mxu1 %vm452_vm1, %v1261_v16 }
 0x34f   :  { %v1135_v22 = vadd.f32 %v3908_v52, %v1134_v21  ;;  %v1237_v23 = vmax.f32 %v1143_v19, 0.0 }
 0x350   :  { %v3252_v25 = vpop.f32.mrf.mxu0 }
 0x351   :  { %v1235_v27 = vmax.f32 %v1135_v22, 0.0  ;;  %v1263_v31 = vpack.c.bf16 %v1237_v23, %v1236_v28  ;;  %v1156_v35 = vadd.f32 %v3252_v25, %v3908_v52 }
 0x352   :  { %v1147_v29 = vpop.f32.mrf.mxu0 }
 0x353   :  { %v1262_v30 = vpack.c.bf16 %v1235_v27, %v1234_v26  ;;  %v1148_v33 = vadd.f32 %v3908_v52, %v1147_v29  ;;  %v1240_v42 = vmax.f32 %v1156_v35, 0.0 }
 0x354   :  { %v3253_v32 = vpop.f32.mrf.mxu0 }
 0x355   :  { %v1159_v34 = vadd.f32 %v3253_v32, %v3908_v52  ;;  %3282 = vmatprep.mubr.msk.bf16.mxu1 %vm452_vm1, %v1262_v30  ;;  %v1238_v40 = vmax.f32 %v1148_v33, 0.0 }
 0x356   :  { %v1150_v36 = vpop.f32.mrf.mxu0  ;;  %3283 = vmatmul.mubr.msk.bf16.gmra.mxu1 %vm452_vm1, %v1263_v31 }
 0x357   :  { %v1151_v37 = vadd.f32 %v3908_v52, %v1150_v36  ;;  %v1241_v38 = vmax.f32 %v1159_v34, 0.0 }
 0x358   :  { %v3256_v39 = vpop.f32.mrf.mxu0 }
 0x359   :  { %v1239_v41 = vmax.f32 %v1151_v37, 0.0  ;;  %v1265_v45 = vpack.c.bf16 %v1241_v38, %v1240_v42  ;;  %v1172_v49 = vadd.f32 %v3256_v39, %v3908_v52  ;;  %v3446_v37 = vld [vmem:[%s4524_s3 + $0x58] sm:$0xff]   ;;  %v3447_v38 = vld [vmem:[%s4524_s3 + $0x50] sm:$0xff]  }
 0x35a   :  { %v1163_v43 = vpop.f32.mrf.mxu0  ;;  %3342 = vmatprep.subr.bf16.mxu1 %v3446_v37 }
 0x35b   :  { %v1264_v44 = vpack.c.bf16 %v1239_v41, %v1238_v40  ;;  %v1164_v47 = vadd.f32 %v3908_v52, %v1163_v43  ;;  %v1244_v56 = vmax.f32 %v1172_v49, 0.0  ;;  %3343 = vmatpush3.bf16.msra.mxu1 %v3446_v37  ;;  %v3967_v40 = vld [vmem:[%s4525_s4 + $0x3] ss:$0 sm:$0xff] }
 0x35c   :  { %v3257_v46 = vpop.f32.mrf.mxu0  ;;  %3344 = vmatprep.subr.bf16.mxu1 %v3447_v38 }
 0x35d   :  { %v1175_v48 = vadd.f32 %v3257_v46, %v3908_v52  ;;  %3286 = vmatprep.mubr.msk.bf16.mxu1 %vm452_vm1, %v1264_v44  ;;  %v1242_v54 = vmax.f32 %v1164_v47, 0.0 }
 0x35e   :  { %v1166_v50 = vpop.f32.mrf.mxu0  ;;  %3287 = vmatmul.mubr.msk.bf16.gmra.mxu1 %vm452_vm1, %v1265_v45 }
 0x35f   :  { %v1167_v0 = vadd.f32 %v3908_v52, %v1166_v50  ;;  %v1245_v51 = vmax.f32 %v1175_v48, 0.0  ;;  %3345 = vmatpush3.bf16.msra.mxu1 %v3447_v38 }
 0x360   :  { %v3260_v53 = vpop.f32.mrf.mxu0 }
 0x361   :  { %v1243_v55 = vmax.f32 %v1167_v0, 0.0  ;;  %v1267_v59 = vpack.c.bf16 %v1245_v51, %v1244_v56  ;;  %v1188_v12 = vadd.f32 %v3260_v53, %v3908_v52 }
 0x362   :  { %v1179_v57 = vpop.f32.mrf.mxu0 }
 0x363   :  { %v1266_v58 = vpack.c.bf16 %v1243_v55, %v1242_v54  ;;  %v1180_v61 = vadd.f32 %v3908_v52, %v1179_v57  ;;  %v1248_v6 = vmax.f32 %v1188_v12, 0.0 }
 0x364   :  { %v3261_v60 = vpop.f32.mrf.mxu0 }
 0x365   :  { %v1191_v62 = vadd.f32 %v3261_v60, %v3908_v52  ;;  %3290 = vmatprep.mubr.msk.bf16.mxu1 %vm452_vm1, %v1266_v58  ;;  %v1246_v4 = vmax.f32 %v1180_v61, 0.0 }
 0x366   :  { %v1182_v63 = vpop.f32.mrf.mxu0  ;;  %3291 = vmatmul.mubr.msk.bf16.gmra.mxu1 %vm452_vm1, %v1267_v59 }
 0x367   :  { %v1183_v1 = vadd.f32 %v3908_v52, %v1182_v63  ;;  %v1249_v2 = vmax.f32 %v1191_v62, 0.0 }
 0x368   :  { %v3264_v3 = vpop.f32.mrf.mxu0 }
 0x369   :  { %v1247_v5 = vmax.f32 %v1183_v1, 0.0  ;;  %v1269_v9 = vpack.c.bf16 %v1249_v2, %v1248_v6  ;;  %v1204_v13 = vadd.f32 %v3264_v3, %v3908_v52 }
 0x36a   :  { %v1195_v7 = vpop.f32.mrf.mxu0 }
 0x36b   :  { %v1268_v8 = vpack.c.bf16 %v1247_v5, %v1246_v4  ;;  %v1196_v24 = vadd.f32 %v3908_v52, %v1195_v7  ;;  %v1252_v20 = vmax.f32 %v1204_v13, 0.0 }
 0x36c   :  { %v3265_v10 = vpop.f32.mrf.mxu0 }
 0x36d   :  { %v1207_v11 = vadd.f32 %v3265_v10, %v3908_v52  ;;  %3294 = vmatprep.mubr.msk.bf16.mxu1 %vm452_vm1, %v1268_v8  ;;  %v1250_v18 = vmax.f32 %v1196_v24, 0.0 }
 0x36e   :  { %v1198_v14 = vpop.f32.mrf.mxu0  ;;  %3295 = vmatmul.mubr.msk.bf16.gmra.mxu1 %vm452_vm1, %v1269_v9 }
 0x36f   :  { %v1199_v15 = vadd.f32 %v3908_v52, %v1198_v14  ;;  %v1253_v16 = vmax.f32 %v1207_v11, 0.0 }
 0x370   :  { %v3268_v17 = vpop.f32.mrf.mxu0 }
 0x371   :  { %v1251_v19 = vmax.f32 %v1199_v15, 0.0  ;;  %v1271_v23 = vpack.c.bf16 %v1253_v16, %v1252_v20  ;;  %v1220_v28 = vadd.f32 %v3268_v17, %v3908_v52 }
 0x372   :  { %v1211_v21 = vpop.f32.mrf.mxu0 }
 0x373   :  { %v1270_v22 = vpack.c.bf16 %v1251_v19, %v1250_v18  ;;  %v1212_v26 = vadd.f32 %v3908_v52, %v1211_v21  ;;  %v1256_v34 = vmax.f32 %v1220_v28, 0.0 }
 0x374   :  { %v3269_v25 = vpop.f32.mrf.mxu0 }
 0x375   :  { %v1223_v27 = vadd.f32 %v3269_v25, %v3908_v52  ;;  %3298 = vmatprep.mubr.msk.bf16.mxu1 %vm452_vm1, %v1270_v22  ;;  %v1254_v32 = vmax.f32 %v1212_v26, 0.0 }
 0x376   :  { %v1214_v29 = vpop.f32.mrf.mxu0  ;;  %3299 = vmatmul.mubr.msk.bf16.gmra.mxu1 %vm452_vm1, %v1271_v23 }
 0x377   :  { %v1215_v30 = vadd.f32 %v3908_v52, %v1214_v29  ;;  %v1257_v31 = vmax.f32 %v1223_v27, 0.0 }
 0x379   :  { %v1255_v33 = vmax.f32 %v1215_v30, 0.0  ;;  %v1273_v36 = vpack.c.bf16 %v1257_v31, %v1256_v34 }
 0x37b   :  { %v1272_v35 = vpack.c.bf16 %v1255_v33, %v1254_v32 }
 0x37d   :  { %3302 = vmatprep.mubr.msk.bf16.mxu1 %vm452_vm1, %v1272_v35 }
 0x37e   :  { %3303 = vmatmul.mubr.msk.bf16.gmra.mxu1 %vm452_vm1, %v1273_v36 }
 0x406   :  { %v3276_v52 = vpop.f32.mrf.mxu1 }
 0x407   :  { %v1390_v44 = vadd.f32 %v3276_v52, %v3967_v40 }
 0x408   :  { %v1381_v39 = vpop.f32.mrf.mxu1 }
 0x409   :  { %v1382_v42 = vadd.f32 %v3967_v40, %v1381_v39  ;;  %v1510_v0 = vmax.f32 %v1390_v44, 0.0 }
 0x40a   :  { %v3277_v41 = vpop.f32.mrf.mxu1 }
 0x40b   :  { %v1393_v43 = vadd.f32 %v3277_v41, %v3967_v40  ;;  %v1508_v49 = vmax.f32 %v1382_v42, 0.0 }
 0x40c   :  { %v1384_v45 = vpop.f32.mrf.mxu1 }
 0x40d   :  { %v1385_v46 = vadd.f32 %v3967_v40, %v1384_v45  ;;  %v1511_v47 = vmax.f32 %v1393_v43, 0.0 }
 0x40e   :  { %v3280_v48 = vpop.f32.mrf.mxu1 }
 0x40f   :  { %v1509_v50 = vmax.f32 %v1385_v46, 0.0  ;;  %v1541_v54 = vpack.c.bf16 %v1511_v47, %v1510_v0  ;;  %v1406_v58 = vadd.f32 %v3280_v48, %v3967_v40 }
 0x410   :  { %v1397_v51 = vpop.f32.mrf.mxu1 }
 0x411   :  { %v1540_v53 = vpack.c.bf16 %v1509_v50, %v1508_v49  ;;  %v1398_v56 = vadd.f32 %v3967_v40, %v1397_v51  ;;  %v1514_v1 = vmax.f32 %v1406_v58, 0.0 }
 0x412   :  { %v3281_v55 = vpop.f32.mrf.mxu1 }
 0x413   :  { %v1409_v57 = vadd.f32 %v3281_v55, %v3967_v40  ;;  %3310 = vmatprep.mubr.msk.bf16.mxu0 %vm452_vm1, %v1540_v53  ;;  %v1512_v12 = vmax.f32 %v1398_v56, 0.0 }
 0x414   :  { %v1400_v59 = vpop.f32.mrf.mxu1  ;;  %3311 = vmatmul.mubr.msk.bf16.vlgmr.msra.gmra.mxu0 %vm452_vm1, %v1541_v54 }
 0x415   :  { %v1401_v60 = vadd.f32 %v3967_v40, %v1400_v59  ;;  %v1515_v61 = vmax.f32 %v1409_v57, 0.0 }
 0x416   :  { %v3284_v62 = vpop.f32.mrf.mxu1 }
 0x417   :  { %v1513_v63 = vmax.f32 %v1401_v60, 0.0  ;;  %v1543_v4 = vpack.c.bf16 %v1515_v61, %v1514_v1  ;;  %v1422_v8 = vadd.f32 %v3284_v62, %v3967_v40 }
 0x418   :  { %v1413_v2 = vpop.f32.mrf.mxu1 }
 0x419   :  { %v1542_v3 = vpack.c.bf16 %v1513_v63, %v1512_v12  ;;  %v1414_v6 = vadd.f32 %v3967_v40, %v1413_v2  ;;  %v1518_v15 = vmax.f32 %v1422_v8, 0.0 }
 0x41a   :  { %v3285_v5 = vpop.f32.mrf.mxu1 }
 0x41b   :  { %v1425_v7 = vadd.f32 %v3285_v5, %v3967_v40  ;;  %3314 = vmatprep.mubr.msk.bf16.mxu0 %vm452_vm1, %v1542_v3  ;;  %v1516_v13 = vmax.f32 %v1414_v6, 0.0 }
 0x41c   :  { %v1416_v9 = vpop.f32.mrf.mxu1  ;;  %3315 = vmatmul.mubr.msk.bf16.gmra.mxu0 %vm452_vm1, %v1543_v4 }
 0x41d   :  { %v1417_v10 = vadd.f32 %v3967_v40, %v1416_v9  ;;  %v1519_v24 = vmax.f32 %v1425_v7, 0.0 }
 0x41e   :  { %v3288_v11 = vpop.f32.mrf.mxu1 }
 0x41f   :  { %v1517_v14 = vmax.f32 %v1417_v10, 0.0  ;;  %v1545_v18 = vpack.c.bf16 %v1519_v24, %v1518_v15  ;;  %v1438_v22 = vadd.f32 %v3288_v11, %v3967_v40 }
 0x420   :  { %v1429_v16 = vpop.f32.mrf.mxu1 }
 0x421   :  { %v1544_v17 = vpack.c.bf16 %v1517_v14, %v1516_v13  ;;  %v1430_v20 = vadd.f32 %v3967_v40, %v1429_v16  ;;  %v1522_v30 = vmax.f32 %v1438_v22, 0.0 }
 0x422   :  { %v3289_v19 = vpop.f32.mrf.mxu1 }
 0x423   :  { %v1441_v21 = vadd.f32 %v3289_v19, %v3967_v40  ;;  %3318 = vmatprep.mubr.msk.bf16.mxu0 %vm452_vm1, %v1544_v17  ;;  %v1520_v28 = vmax.f32 %v1430_v20, 0.0 }
 0x424   :  { %v1432_v23 = vpop.f32.mrf.mxu1  ;;  %3319 = vmatmul.mubr.msk.bf16.gmra.mxu0 %vm452_vm1, %v1545_v18 }
 0x425   :  { %v1433_v25 = vadd.f32 %v3967_v40, %v1432_v23  ;;  %v1523_v26 = vmax.f32 %v1441_v21, 0.0 }
 0x426   :  { %v3292_v27 = vpop.f32.mrf.mxu1 }
 0x427   :  { %v1521_v29 = vmax.f32 %v1433_v25, 0.0  ;;  %v1547_v33 = vpack.c.bf16 %v1523_v26, %v1522_v30  ;;  %v1454_v37 = vadd.f32 %v3292_v27, %v3967_v40  ;;  %v3448_v25 = vld [vmem:[%s4526_s5 + $0x8] sm:$0xff]   ;;  %v3449_v26 = vld [vmem:[%s4526_s5] sm:$0xff]  }
 0x428   :  { %v1445_v31 = vpop.f32.mrf.mxu1  ;;  %3378 = vmatprep.subr.bf16.mxu0 %v3448_v25 }
 0x429   :  { %v1546_v32 = vpack.c.bf16 %v1521_v29, %v1520_v28  ;;  %v1446_v35 = vadd.f32 %v3967_v40, %v1445_v31  ;;  %v1526_v44 = vmax.f32 %v1454_v37, 0.0  ;;  %3379 = vmatpush3.bf16.msra.mxu0 %v3448_v25  ;;  %v4026_v28 = vld [vmem:[%s4525_s4 + $0x4] ss:$0 sm:$0xff] }
 0x42a   :  { %v3293_v34 = vpop.f32.mrf.mxu1  ;;  %3380 = vmatprep.subr.bf16.mxu0 %v3449_v26 }
 0x42b   :  { %v1457_v36 = vadd.f32 %v3293_v34, %v3967_v40  ;;  %3322 = vmatprep.mubr.msk.bf16.mxu0 %vm452_vm1, %v1546_v32  ;;  %v1524_v42 = vmax.f32 %v1446_v35, 0.0 }
 0x42c   :  { %v1448_v38 = vpop.f32.mrf.mxu1  ;;  %3323 = vmatmul.mubr.msk.bf16.gmra.mxu0 %vm452_vm1, %v1547_v33 }
 0x42d   :  { %v1449_v52 = vadd.f32 %v3967_v40, %v1448_v38  ;;  %v1527_v39 = vmax.f32 %v1457_v36, 0.0  ;;  %3381 = vmatpush3.bf16.msra.mxu0 %v3449_v26 }
 0x42e   :  { %v3296_v41 = vpop.f32.mrf.mxu1 }
 0x42f   :  { %v1525_v43 = vmax.f32 %v1449_v52, 0.0  ;;  %v1549_v47 = vpack.c.bf16 %v1527_v39, %v1526_v44  ;;  %v1470_v0 = vadd.f32 %v3296_v41, %v3967_v40 }
 0x430   :  { %v1461_v45 = vpop.f32.mrf.mxu1 }
 0x431   :  { %v1548_v46 = vpack.c.bf16 %v1525_v43, %v1524_v42  ;;  %v1462_v49 = vadd.f32 %v3967_v40, %v1461_v45  ;;  %v1530_v58 = vmax.f32 %v1470_v0, 0.0 }
 0x432   :  { %v3297_v48 = vpop.f32.mrf.mxu1 }
 0x433   :  { %v1473_v50 = vadd.f32 %v3297_v48, %v3967_v40  ;;  %3326 = vmatprep.mubr.msk.bf16.mxu0 %vm452_vm1, %v1548_v46  ;;  %v1528_v56 = vmax.f32 %v1462_v49, 0.0 }
 0x434   :  { %v1464_v51 = vpop.f32.mrf.mxu1  ;;  %3327 = vmatmul.mubr.msk.bf16.gmra.mxu0 %vm452_vm1, %v1549_v47 }
 0x435   :  { %v1465_v53 = vadd.f32 %v3967_v40, %v1464_v51  ;;  %v1531_v54 = vmax.f32 %v1473_v50, 0.0 }
 0x436   :  { %v3300_v55 = vpop.f32.mrf.mxu1 }
 0x437   :  { %v1529_v57 = vmax.f32 %v1465_v53, 0.0  ;;  %v1551_v61 = vpack.c.bf16 %v1531_v54, %v1530_v58  ;;  %v1486_v1 = vadd.f32 %v3300_v55, %v3967_v40 }
 0x438   :  { %v1477_v59 = vpop.f32.mrf.mxu1 }
 0x439   :  { %v1550_v60 = vpack.c.bf16 %v1529_v57, %v1528_v56  ;;  %v1478_v12 = vadd.f32 %v3967_v40, %v1477_v59  ;;  %v1534_v8 = vmax.f32 %v1486_v1, 0.0 }
 0x43a   :  { %v3301_v62 = vpop.f32.mrf.mxu1 }
 0x43b   :  { %v1489_v63 = vadd.f32 %v3301_v62, %v3967_v40  ;;  %3330 = vmatprep.mubr.msk.bf16.mxu0 %vm452_vm1, %v1550_v60  ;;  %v1532_v6 = vmax.f32 %v1478_v12, 0.0 }
 0x43c   :  { %v1480_v2 = vpop.f32.mrf.mxu1  ;;  %3331 = vmatmul.mubr.msk.bf16.gmra.mxu0 %vm452_vm1, %v1551_v61 }
 0x43d   :  { %v1481_v3 = vadd.f32 %v3967_v40, %v1480_v2  ;;  %v1535_v4 = vmax.f32 %v1489_v63, 0.0 }
 0x43e   :  { %v3304_v5 = vpop.f32.mrf.mxu1 }
 0x43f   :  { %v1533_v7 = vmax.f32 %v1481_v3, 0.0  ;;  %v1553_v24 = vpack.c.bf16 %v1535_v4, %v1534_v8  ;;  %v1502_v15 = vadd.f32 %v3304_v5, %v3967_v40 }
 0x440   :  { %v1493_v9 = vpop.f32.mrf.mxu1 }
 0x441   :  { %v1552_v10 = vpack.c.bf16 %v1533_v7, %v1532_v6  ;;  %v1494_v13 = vadd.f32 %v3967_v40, %v1493_v9  ;;  %v1538_v21 = vmax.f32 %v1502_v15, 0.0 }
 0x442   :  { %v3305_v11 = vpop.f32.mrf.mxu1 }
 0x443   :  { %v1505_v14 = vadd.f32 %v3305_v11, %v3967_v40  ;;  %3334 = vmatprep.mubr.msk.bf16.mxu0 %vm452_vm1, %v1552_v10  ;;  %v1536_v19 = vmax.f32 %v1494_v13, 0.0 }
 0x444   :  { %v1496_v16 = vpop.f32.mrf.mxu1  ;;  %3335 = vmatmul.mubr.msk.bf16.gmra.mxu0 %vm452_vm1, %v1553_v24 }
 0x445   :  { %v1497_v17 = vadd.f32 %v3967_v40, %v1496_v16  ;;  %v1539_v18 = vmax.f32 %v1505_v14, 0.0 }
 0x447   :  { %v1537_v20 = vmax.f32 %v1497_v17, 0.0  ;;  %v1555_v23 = vpack.c.bf16 %v1539_v18, %v1538_v21 }
 0x449   :  { %v1554_v22 = vpack.c.bf16 %v1537_v20, %v1536_v19 }
 0x44b   :  { %3338 = vmatprep.mubr.msk.bf16.mxu0 %vm452_vm1, %v1554_v22 }
 0x44c   :  { %3339 = vmatmul.mubr.msk.bf16.gmra.mxu0 %vm452_vm1, %v1555_v23 }
 0x4d4   :  { %v3312_v40 = vpop.f32.mrf.mxu0 }
 0x4d5   :  { %v1672_v32 = vadd.f32 %v3312_v40, %v4026_v28 }
 0x4d6   :  { %v1663_v27 = vpop.f32.mrf.mxu0 }
 0x4d7   :  { %v1664_v30 = vadd.f32 %v4026_v28, %v1663_v27  ;;  %v1792_v52 = vmax.f32 %v1672_v32, 0.0 }
 0x4d8   :  { %v3313_v29 = vpop.f32.mrf.mxu0 }
 0x4d9   :  { %v1675_v31 = vadd.f32 %v3313_v29, %v4026_v28  ;;  %v1790_v37 = vmax.f32 %v1664_v30, 0.0 }
 0x4da   :  { %v1666_v33 = vpop.f32.mrf.mxu0 }
 0x4db   :  { %v1667_v34 = vadd.f32 %v4026_v28, %v1666_v33  ;;  %v1793_v35 = vmax.f32 %v1675_v31, 0.0 }
 0x4dc   :  { %v3316_v36 = vpop.f32.mrf.mxu0 }
 0x4dd   :  { %v1791_v38 = vmax.f32 %v1667_v34, 0.0  ;;  %v1823_v42 = vpack.c.bf16 %v1793_v35, %v1792_v52  ;;  %v1688_v46 = vadd.f32 %v3316_v36, %v4026_v28 }
 0x4de   :  { %v1679_v39 = vpop.f32.mrf.mxu0 }
 0x4df   :  { %v1822_v41 = vpack.c.bf16 %v1791_v38, %v1790_v37  ;;  %v1680_v44 = vadd.f32 %v4026_v28, %v1679_v39  ;;  %v1796_v53 = vmax.f32 %v1688_v46, 0.0 }
 0x4e0   :  { %v3317_v43 = vpop.f32.mrf.mxu0 }
 0x4e1   :  { %v1691_v45 = vadd.f32 %v3317_v43, %v4026_v28  ;;  %3346 = vmatprep.mubr.msk.bf16.mxu1 %vm452_vm1, %v1822_v41  ;;  %v1794_v0 = vmax.f32 %v1680_v44, 0.0 }
 0x4e2   :  { %v1682_v47 = vpop.f32.mrf.mxu0  ;;  %3347 = vmatmul.mubr.msk.bf16.vlgmr.msra.gmra.mxu1 %vm452_vm1, %v1823_v42 }
 0x4e3   :  { %v1683_v48 = vadd.f32 %v4026_v28, %v1682_v47  ;;  %v1797_v49 = vmax.f32 %v1691_v45, 0.0 }
 0x4e4   :  { %v3320_v50 = vpop.f32.mrf.mxu0 }
 0x4e5   :  { %v1795_v51 = vmax.f32 %v1683_v48, 0.0  ;;  %v1825_v56 = vpack.c.bf16 %v1797_v49, %v1796_v53  ;;  %v1704_v60 = vadd.f32 %v3320_v50, %v4026_v28 }
 0x4e6   :  { %v1695_v54 = vpop.f32.mrf.mxu0 }
 0x4e7   :  { %v1824_v55 = vpack.c.bf16 %v1795_v51, %v1794_v0  ;;  %v1696_v58 = vadd.f32 %v4026_v28, %v1695_v54  ;;  %v1800_v3 = vmax.f32 %v1704_v60, 0.0 }
 0x4e8   :  { %v3321_v57 = vpop.f32.mrf.mxu0 }
 0x4e9   :  { %v1707_v59 = vadd.f32 %v3321_v57, %v4026_v28  ;;  %3350 = vmatprep.mubr.msk.bf16.mxu1 %vm452_vm1, %v1824_v55  ;;  %v1798_v1 = vmax.f32 %v1696_v58, 0.0 }
 0x4ea   :  { %v1698_v61 = vpop.f32.mrf.mxu0  ;;  %3351 = vmatmul.mubr.msk.bf16.gmra.mxu1 %vm452_vm1, %v1825_v56 }
 0x4eb   :  { %v1699_v62 = vadd.f32 %v4026_v28, %v1698_v61  ;;  %v1801_v12 = vmax.f32 %v1707_v59, 0.0 }
 0x4ec   :  { %v3324_v63 = vpop.f32.mrf.mxu0 }
 0x4ed   :  { %v1799_v2 = vmax.f32 %v1699_v62, 0.0  ;;  %v1827_v6 = vpack.c.bf16 %v1801_v12, %v1800_v3  ;;  %v1720_v10 = vadd.f32 %v3324_v63, %v4026_v28 }
 0x4ee   :  { %v1711_v4 = vpop.f32.mrf.mxu0 }
 0x4ef   :  { %v1826_v5 = vpack.c.bf16 %v1799_v2, %v1798_v1  ;;  %v1712_v8 = vadd.f32 %v4026_v28, %v1711_v4  ;;  %v1804_v17 = vmax.f32 %v1720_v10, 0.0 }
 0x4f0   :  { %v3325_v7 = vpop.f32.mrf.mxu0 }
 0x4f1   :  { %v1723_v9 = vadd.f32 %v3325_v7, %v4026_v28  ;;  %3354 = vmatprep.mubr.msk.bf16.mxu1 %vm452_vm1, %v1826_v5  ;;  %v1802_v15 = vmax.f32 %v1712_v8, 0.0 }
 0x4f2   :  { %v1714_v24 = vpop.f32.mrf.mxu0  ;;  %3355 = vmatmul.mubr.msk.bf16.gmra.mxu1 %vm452_vm1, %v1827_v6 }
 0x4f3   :  { %v1715_v11 = vadd.f32 %v4026_v28, %v1714_v24  ;;  %v1805_v13 = vmax.f32 %v1723_v9, 0.0 }
 0x4f4   :  { %v3328_v14 = vpop.f32.mrf.mxu0 }
 0x4f5   :  { %v1803_v16 = vmax.f32 %v1715_v11, 0.0  ;;  %v1829_v20 = vpack.c.bf16 %v1805_v13, %v1804_v17  ;;  %v1736_v25 = vadd.f32 %v3328_v14, %v4026_v28  ;;  %v4079_v14 = vld [vmem:[%s4525_s4 + $0x5] ss:$0 sm:$0xff] }
 0x4f6   :  { %v1727_v18 = vpop.f32.mrf.mxu0 }
 0x4f7   :  { %v1828_v19 = vpack.c.bf16 %v1803_v16, %v1802_v15  ;;  %v1728_v22 = vadd.f32 %v4026_v28, %v1727_v18  ;;  %v1808_v32 = vmax.f32 %v1736_v25, 0.0 }
 0x4f8   :  { %v3329_v21 = vpop.f32.mrf.mxu0 }
 0x4f9   :  { %v1739_v23 = vadd.f32 %v3329_v21, %v4026_v28  ;;  %3358 = vmatprep.mubr.msk.bf16.mxu1 %vm452_vm1, %v1828_v19  ;;  %v1806_v30 = vmax.f32 %v1728_v22, 0.0 }
 0x4fa   :  { %v1730_v26 = vpop.f32.mrf.mxu0  ;;  %3359 = vmatmul.mubr.msk.bf16.gmra.mxu1 %vm452_vm1, %v1829_v20 }
 0x4fb   :  { %v1731_v40 = vadd.f32 %v4026_v28, %v1730_v26  ;;  %v1809_v27 = vmax.f32 %v1739_v23, 0.0 }
 0x4fc   :  { %v3332_v29 = vpop.f32.mrf.mxu0 }
 0x4fd   :  { %v1807_v31 = vmax.f32 %v1731_v40, 0.0  ;;  %v1831_v35 = vpack.c.bf16 %v1809_v27, %v1808_v32  ;;  %v1752_v52 = vadd.f32 %v3332_v29, %v4026_v28 }
 0x4fe   :  { %v1743_v33 = vpop.f32.mrf.mxu0 }
 0x4ff   :  { %v1830_v34 = vpack.c.bf16 %v1807_v31, %v1806_v30  ;;  %v1744_v37 = vadd.f32 %v4026_v28, %v1743_v33  ;;  %v1812_v46 = vmax.f32 %v1752_v52, 0.0 }
 0x500   :  { %v3333_v36 = vpop.f32.mrf.mxu0 }
 0x501   :  { %v1755_v38 = vadd.f32 %v3333_v36, %v4026_v28  ;;  %3362 = vmatprep.mubr.msk.bf16.mxu1 %vm452_vm1, %v1830_v34  ;;  %v1810_v44 = vmax.f32 %v1744_v37, 0.0 }
 0x502   :  { %v1746_v39 = vpop.f32.mrf.mxu0  ;;  %3363 = vmatmul.mubr.msk.bf16.gmra.mxu1 %vm452_vm1, %v1831_v35 }
 0x503   :  { %v1747_v41 = vadd.f32 %v4026_v28, %v1746_v39  ;;  %v1813_v42 = vmax.f32 %v1755_v38, 0.0 }
 0x504   :  { %v3336_v43 = vpop.f32.mrf.mxu0 }
 0x505   :  { %v1811_v45 = vmax.f32 %v1747_v41, 0.0  ;;  %v1833_v49 = vpack.c.bf16 %v1813_v42, %v1812_v46  ;;  %v1768_v53 = vadd.f32 %v3336_v43, %v4026_v28 }
 0x506   :  { %v1759_v47 = vpop.f32.mrf.mxu0 }
 0x507   :  { %v1832_v48 = vpack.c.bf16 %v1811_v45, %v1810_v44  ;;  %v1760_v0 = vadd.f32 %v4026_v28, %v1759_v47  ;;  %v1816_v60 = vmax.f32 %v1768_v53, 0.0 }
 0x508   :  { %v3337_v50 = vpop.f32.mrf.mxu0 }
 0x509   :  { %v1771_v51 = vadd.f32 %v3337_v50, %v4026_v28  ;;  %3366 = vmatprep.mubr.msk.bf16.mxu1 %vm452_vm1, %v1832_v48  ;;  %v1814_v58 = vmax.f32 %v1760_v0, 0.0 }
 0x50a   :  { %v1762_v54 = vpop.f32.mrf.mxu0  ;;  %3367 = vmatmul.mubr.msk.bf16.gmra.mxu1 %vm452_vm1, %v1833_v49 }
 0x50b   :  { %v1763_v55 = vadd.f32 %v4026_v28, %v1762_v54  ;;  %v1817_v56 = vmax.f32 %v1771_v51, 0.0 }
 0x50c   :  { %v3340_v57 = vpop.f32.mrf.mxu0 }
 0x50d   :  { %v1815_v59 = vmax.f32 %v1763_v55, 0.0  ;;  %v1835_v12 = vpack.c.bf16 %v1817_v56, %v1816_v60  ;;  %v1784_v3 = vadd.f32 %v3340_v57, %v4026_v28 }
 0x50e   :  { %v1775_v61 = vpop.f32.mrf.mxu0 }
 0x50f   :  { %v1834_v62 = vpack.c.bf16 %v1815_v59, %v1814_v58  ;;  %v1776_v1 = vadd.f32 %v4026_v28, %v1775_v61  ;;  %v1820_v9 = vmax.f32 %v1784_v3, 0.0 }
 0x510   :  { %v3341_v63 = vpop.f32.mrf.mxu0 }
 0x511   :  { %v1787_v2 = vadd.f32 %v3341_v63, %v4026_v28  ;;  %3370 = vmatprep.mubr.msk.bf16.mxu1 %vm452_vm1, %v1834_v62  ;;  %v1818_v7 = vmax.f32 %v1776_v1, 0.0 }
 0x512   :  { %v1778_v4 = vpop.f32.mrf.mxu0  ;;  %3371 = vmatmul.mubr.msk.bf16.gmra.mxu1 %vm452_vm1, %v1835_v12 }
 0x513   :  { %v1779_v5 = vadd.f32 %v4026_v28, %v1778_v4  ;;  %v1821_v6 = vmax.f32 %v1787_v2, 0.0 }
 0x515   :  { %v1819_v8 = vmax.f32 %v1779_v5, 0.0  ;;  %v1837_v24 = vpack.c.bf16 %v1821_v6, %v1820_v9 }
 0x517   :  { %v1836_v10 = vpack.c.bf16 %v1819_v8, %v1818_v7 }
 0x519   :  { %3374 = vmatprep.mubr.msk.bf16.mxu1 %vm452_vm1, %v1836_v10 }
 0x51a   :  { %3375 = vmatmul.mubr.msk.bf16.gmra.mxu1 %vm452_vm1, %v1837_v24 }
 0x5a2   :  { %v3348_v11 = vpop.f32.mrf.mxu1 }
 0x5a3   :  { %v1954_v17 = vadd.f32 %v3348_v11, %v4079_v14 }
 0x5a4   :  { %v1945_v13 = vpop.f32.mrf.mxu1 }
 0x5a5   :  { %v1946_v28 = vadd.f32 %v4079_v14, %v1945_v13  ;;  %v2074_v25 = vmax.f32 %v1954_v17, 0.0 }
 0x5a6   :  { %v3349_v15 = vpop.f32.mrf.mxu1 }
 0x5a7   :  { %v1957_v16 = vadd.f32 %v3349_v15, %v4079_v14  ;;  %v2072_v22 = vmax.f32 %v1946_v28, 0.0 }
 0x5a8   :  { %v1948_v18 = vpop.f32.mrf.mxu1 }
 0x5a9   :  { %v1949_v19 = vadd.f32 %v4079_v14, %v1948_v18  ;;  %v2075_v20 = vmax.f32 %v1957_v16, 0.0 }
 0x5aa   :  { %v3352_v21 = vpop.f32.mrf.mxu1 }
 0x5ab   :  { %v2073_v23 = vmax.f32 %v1949_v19, 0.0  ;;  %v2105_v27 = vpack.c.bf16 %v2075_v20, %v2074_v25  ;;  %v1970_v32 = vadd.f32 %v3352_v21, %v4079_v14 }
 0x5ac   :  { %v1961_v26 = vpop.f32.mrf.mxu1 }
 0x5ad   :  { %v2104_v40 = vpack.c.bf16 %v2073_v23, %v2072_v22  ;;  %v1962_v30 = vadd.f32 %v4079_v14, %v1961_v26  ;;  %v2078_v52 = vmax.f32 %v1970_v32, 0.0 }
 0x5ae   :  { %v3353_v29 = vpop.f32.mrf.mxu1 }
 0x5af   :  { %v1973_v31 = vadd.f32 %v3353_v29, %v4079_v14  ;;  %3382 = vmatprep.mubr.msk.bf16.mxu0 %vm452_vm1, %v2104_v40  ;;  %v2076_v37 = vmax.f32 %v1962_v30, 0.0 }
 0x5b0   :  { %v1964_v33 = vpop.f32.mrf.mxu1  ;;  %3383 = vmatmul.mubr.msk.bf16.vlgmr.msra.gmra.mxu0 %vm452_vm1, %v2105_v27 }
 0x5b1   :  { %v1965_v34 = vadd.f32 %v4079_v14, %v1964_v33  ;;  %v2079_v35 = vmax.f32 %v1973_v31, 0.0 }
 0x5b2   :  { %v3356_v36 = vpop.f32.mrf.mxu1 }
 0x5b3   :  { %v2077_v38 = vmax.f32 %v1965_v34, 0.0  ;;  %v2107_v42 = vpack.c.bf16 %v2079_v35, %v2078_v52  ;;  %v1986_v46 = vadd.f32 %v3356_v36, %v4079_v14 }
 0x5b4   :  { %v1977_v39 = vpop.f32.mrf.mxu1 }
 0x5b5   :  { %v2106_v41 = vpack.c.bf16 %v2077_v38, %v2076_v37  ;;  %v1978_v44 = vadd.f32 %v4079_v14, %v1977_v39  ;;  %v2082_v53 = vmax.f32 %v1986_v46, 0.0 }
 0x5b6   :  { %v3357_v43 = vpop.f32.mrf.mxu1 }
 0x5b7   :  { %v1989_v45 = vadd.f32 %v3357_v43, %v4079_v14  ;;  %3386 = vmatprep.mubr.msk.bf16.mxu0 %vm452_vm1, %v2106_v41  ;;  %v2080_v0 = vmax.f32 %v1978_v44, 0.0 }
 0x5b8   :  { %v1980_v47 = vpop.f32.mrf.mxu1  ;;  %3387 = vmatmul.mubr.msk.bf16.gmra.mxu0 %vm452_vm1, %v2107_v42 }
 0x5b9   :  { %v1981_v48 = vadd.f32 %v4079_v14, %v1980_v47  ;;  %v2083_v49 = vmax.f32 %v1989_v45, 0.0 }
 0x5ba   :  { %v3360_v50 = vpop.f32.mrf.mxu1 }
 0x5bb   :  { %v2081_v51 = vmax.f32 %v1981_v48, 0.0  ;;  %v2109_v56 = vpack.c.bf16 %v2083_v49, %v2082_v53  ;;  %v2002_v60 = vadd.f32 %v3360_v50, %v4079_v14 }
 0x5bc   :  { %v1993_v54 = vpop.f32.mrf.mxu1 }
 0x5bd   :  { %v2108_v55 = vpack.c.bf16 %v2081_v51, %v2080_v0  ;;  %v1994_v58 = vadd.f32 %v4079_v14, %v1993_v54  ;;  %v2086_v3 = vmax.f32 %v2002_v60, 0.0 }
 0x5be   :  { %v3361_v57 = vpop.f32.mrf.mxu1 }
 0x5bf   :  { %v2005_v59 = vadd.f32 %v3361_v57, %v4079_v14  ;;  %3390 = vmatprep.mubr.msk.bf16.mxu0 %vm452_vm1, %v2108_v55  ;;  %v2084_v1 = vmax.f32 %v1994_v58, 0.0 }
 0x5c0   :  { %v1996_v61 = vpop.f32.mrf.mxu1  ;;  %3391 = vmatmul.mubr.msk.bf16.gmra.mxu0 %vm452_vm1, %v2109_v56 }
 0x5c1   :  { %v1997_v62 = vadd.f32 %v4079_v14, %v1996_v61  ;;  %v2087_v12 = vmax.f32 %v2005_v59, 0.0 }
 0x5c2   :  { %v3364_v63 = vpop.f32.mrf.mxu1 }
 0x5c3   :  { %v2085_v2 = vmax.f32 %v1997_v62, 0.0  ;;  %v2111_v6 = vpack.c.bf16 %v2087_v12, %v2086_v3  ;;  %v2018_v10 = vadd.f32 %v3364_v63, %v4079_v14  ;;  %v4132_v62 = vld [vmem:[%s4527_s6] ss:$0 sm:$0xff] }
 0x5c4   :  { %v2009_v4 = vpop.f32.mrf.mxu1 }
 0x5c5   :  { %v2110_v5 = vpack.c.bf16 %v2085_v2, %v2084_v1  ;;  %v2010_v8 = vadd.f32 %v4079_v14, %v2009_v4  ;;  %v2090_v17 = vmax.f32 %v2018_v10, 0.0 }
 0x5c6   :  { %v3365_v7 = vpop.f32.mrf.mxu1 }
 0x5c7   :  { %v2021_v9 = vadd.f32 %v3365_v7, %v4079_v14  ;;  %3394 = vmatprep.mubr.msk.bf16.mxu0 %vm452_vm1, %v2110_v5  ;;  %v2088_v28 = vmax.f32 %v2010_v8, 0.0 }
 0x5c8   :  { %v2012_v24 = vpop.f32.mrf.mxu1  ;;  %3395 = vmatmul.mubr.msk.bf16.gmra.mxu0 %vm452_vm1, %v2111_v6 }
 0x5c9   :  { %v2013_v11 = vadd.f32 %v4079_v14, %v2012_v24  ;;  %v2091_v13 = vmax.f32 %v2021_v9, 0.0 }
 0x5ca   :  { %v3368_v15 = vpop.f32.mrf.mxu1 }
 0x5cb   :  { %v2089_v16 = vmax.f32 %v2013_v11, 0.0  ;;  %v2113_v20 = vpack.c.bf16 %v2091_v13, %v2090_v17  ;;  %v2034_v25 = vadd.f32 %v3368_v15, %v4079_v14 }
 0x5cc   :  { %v2025_v18 = vpop.f32.mrf.mxu1 }
 0x5cd   :  { %v2112_v19 = vpack.c.bf16 %v2089_v16, %v2088_v28  ;;  %v2026_v22 = vadd.f32 %v4079_v14, %v2025_v18  ;;  %v2094_v32 = vmax.f32 %v2034_v25, 0.0 }
 0x5ce   :  { %v3369_v21 = vpop.f32.mrf.mxu1 }
 0x5cf   :  { %v2037_v23 = vadd.f32 %v3369_v21, %v4079_v14  ;;  %3398 = vmatprep.mubr.msk.bf16.mxu0 %vm452_vm1, %v2112_v19  ;;  %v2092_v30 = vmax.f32 %v2026_v22, 0.0 }
 0x5d0   :  { %v2028_v26 = vpop.f32.mrf.mxu1  ;;  %3399 = vmatmul.mubr.msk.bf16.gmra.mxu0 %vm452_vm1, %v2113_v20 }
 0x5d1   :  { %v2029_v40 = vadd.f32 %v4079_v14, %v2028_v26  ;;  %v2095_v27 = vmax.f32 %v2037_v23, 0.0 }
 0x5d2   :  { %v3372_v29 = vpop.f32.mrf.mxu1 }
 0x5d3   :  { %v2093_v31 = vmax.f32 %v2029_v40, 0.0  ;;  %v2115_v35 = vpack.c.bf16 %v2095_v27, %v2094_v32  ;;  %v2050_v52 = vadd.f32 %v3372_v29, %v4079_v14 }
 0x5d4   :  { %v2041_v33 = vpop.f32.mrf.mxu1 }
 0x5d5   :  { %v2114_v34 = vpack.c.bf16 %v2093_v31, %v2092_v30  ;;  %v2042_v37 = vadd.f32 %v4079_v14, %v2041_v33  ;;  %v2098_v46 = vmax.f32 %v2050_v52, 0.0 }
 0x5d6   :  { %v3373_v36 = vpop.f32.mrf.mxu1 }
 0x5d7   :  { %v2053_v38 = vadd.f32 %v3373_v36, %v4079_v14  ;;  %3402 = vmatprep.mubr.msk.bf16.mxu0 %vm452_vm1, %v2114_v34  ;;  %v2096_v44 = vmax.f32 %v2042_v37, 0.0 }
 0x5d8   :  { %v2044_v39 = vpop.f32.mrf.mxu1  ;;  %3403 = vmatmul.mubr.msk.bf16.gmra.mxu0 %vm452_vm1, %v2115_v35 }
 0x5d9   :  { %v2045_v41 = vadd.f32 %v4079_v14, %v2044_v39  ;;  %v2099_v42 = vmax.f32 %v2053_v38, 0.0 }
 0x5da   :  { %v3376_v43 = vpop.f32.mrf.mxu1 }
 0x5db   :  { %v2097_v45 = vmax.f32 %v2045_v41, 0.0  ;;  %v2117_v49 = vpack.c.bf16 %v2099_v42, %v2098_v46  ;;  %v2066_v53 = vadd.f32 %v3376_v43, %v4079_v14 }
 0x5dc   :  { %v2057_v47 = vpop.f32.mrf.mxu1 }
 0x5dd   :  { %v2116_v48 = vpack.c.bf16 %v2097_v45, %v2096_v44  ;;  %v2058_v0 = vadd.f32 %v4079_v14, %v2057_v47  ;;  %v2102_v59 = vmax.f32 %v2066_v53, 0.0 }
 0x5de   :  { %v3377_v50 = vpop.f32.mrf.mxu1 }
 0x5df   :  { %v2069_v51 = vadd.f32 %v3377_v50, %v4079_v14  ;;  %3406 = vmatprep.mubr.msk.bf16.mxu0 %vm452_vm1, %v2116_v48  ;;  %v2100_v57 = vmax.f32 %v2058_v0, 0.0 }
 0x5e0   :  { %v2060_v54 = vpop.f32.mrf.mxu1  ;;  %3407 = vmatmul.mubr.msk.bf16.gmra.mxu0 %vm452_vm1, %v2117_v49 }
 0x5e1   :  { %v2061_v55 = vadd.f32 %v4079_v14, %v2060_v54  ;;  %v2103_v56 = vmax.f32 %v2069_v51, 0.0 }
 0x5e3   :  { %v2101_v58 = vmax.f32 %v2061_v55, 0.0  ;;  %v2119_v61 = vpack.c.bf16 %v2103_v56, %v2102_v59 }
 0x5e5   :  { %v2118_v60 = vpack.c.bf16 %v2101_v58, %v2100_v57 }
 0x5e7   :  { %3410 = vmatprep.mubr.msk.bf16.mxu0 %vm452_vm1, %v2118_v60 }
 0x5e8   :  { %3411 = vmatmul.mubr.msk.bf16.gmra.mxu0 %vm452_vm1, %v2119_v61 }
 0x670   :  { %v3384_v12 = vpop.f32.mrf.mxu0 }
 0x671   :  { %v4135_v63 = vadd.f32 %v3384_v12, %v4132_v62 }
 0x672   :  { %v2225_v14 = vpop.f32.mrf.mxu0 }
 0x673   :  { %v4138_v1 = vadd.f32 %v4132_v62, %v2225_v14  ;;  %v2359_v2 = vsel %vm2352_vm2, %v4135_v63, -inf }
 0x674   :  { %2360 = vmax.xlane.f32.xlu1 %v2359_v2  ;;  %v3385_v3 = vpop.f32.mrf.mxu0 }
 0x675   :  { %v4143_v4 = vadd.f32 %v3385_v3, %v4132_v62  ;;  %v2353_v5 = vsel %vm2352_vm2, %v4138_v1, -inf }
 0x676   :  { %v2228_v6 = vpop.f32.mrf.mxu0  ;;  %2354 = vmax.xlane.f32.xlu0 %v2353_v5 }
 0x677   :  { %v4148_v7 = vadd.f32 %v4132_v62, %v2228_v6  ;;  %v2362_v8 = vsel %vm2352_vm2, %v4143_v4, -inf }
 0x678   :  { %2363 = vmax.xlane.f32.xlu1 %v2362_v8  ;;  %v3388_v9 = vpop.f32.mrf.mxu0 }
 0x679   :  { %v4153_v10 = vadd.f32 %v3388_v9, %v4132_v62  ;;  %v2356_v24 = vsel %vm2352_vm2, %v4148_v7, -inf }
 0x67a   :  { %v2241_v11 = vpop.f32.mrf.mxu0  ;;  %2357 = vmax.xlane.f32.xlu0 %v2356_v24 }
 0x67b   :  { %v4158_v15 = vadd.f32 %v4132_v62, %v2241_v11  ;;  %v2371_v16 = vsel %vm2352_vm2, %v4153_v10, -inf }
 0x67c   :  { %v3389_v13 = vpop.f32.mrf.mxu0 }
 0x67d   :  { %v4161_v28 = vadd.f32 %v3389_v13, %v4132_v62  ;;  %v2365_v22 = vsel %vm2352_vm2, %v4158_v15, -inf }
 0x67e   :  { %v2244_v17 = vpop.f32.mrf.mxu0  ;;  %2372 = vmax.xlane.f32.xlu0 %v2371_v16 }
 0x67f   :  { %v4166_v18 = vadd.f32 %v4132_v62, %v2244_v17  ;;  %v2374_v19 = vsel %vm2352_vm2, %v4161_v28, -inf }
 0x680   :  { %2375 = vmax.xlane.f32.xlu1 %v2374_v19  ;;  %v3392_v20 = vpop.f32.mrf.mxu0 }
 0x681   :  { %v4171_v21 = vadd.f32 %v3392_v20, %v4132_v62  ;;  %v2368_v25 = vsel %vm2352_vm2, %v4166_v18, -inf }
 0x682   :  { %v2257_v23 = vpop.f32.mrf.mxu0  ;;  %2366 = vmax.xlane.f32.xlu0 %v2365_v22 }
 0x683   :  { %v4178_v40 = vadd.f32 %v4132_v62, %v2257_v23  ;;  %v2383_v29 = vsel %vm2352_vm2, %v4171_v21, -inf }
 0x684   :  { %v3393_v26 = vpop.f32.mrf.mxu0  ;;  %2369 = vmax.xlane.f32.xlu1 %v2368_v25 }
 0x685   :  { %v4181_v27 = vadd.f32 %v3393_v26, %v4132_v62  ;;  %v2377_v35 = vsel %vm2352_vm2, %v4178_v40, -inf }
 0x686   :  { %v2260_v30 = vpop.f32.mrf.mxu0  ;;  %2384 = vmax.xlane.f32.xlu0 %v2383_v29 }
 0x687   :  { %v4186_v31 = vadd.f32 %v4132_v62, %v2260_v30  ;;  %v2386_v32 = vsel %vm2352_vm2, %v4181_v27, -inf }
 0x688   :  { %v3396_v33 = vpop.f32.mrf.mxu0  ;;  %2387 = vmax.xlane.f32.xlu1 %v2386_v32 }
 0x689   :  { %v4191_v34 = vadd.f32 %v3396_v33, %v4132_v62  ;;  %v2380_v37 = vsel %vm2352_vm2, %v4186_v31, -inf }
 0x68a   :  { %v2273_v36 = vpop.f32.mrf.mxu0  ;;  %2378 = vmax.xlane.f32.xlu0 %v2377_v35 }
 0x68b   :  { %v4198_v52 = vadd.f32 %v4132_v62, %v2273_v36  ;;  %v2395_v41 = vsel %vm2352_vm2, %v4191_v34, -inf }
 0x68c   :  { %v3397_v38 = vpop.f32.mrf.mxu0  ;;  %2381 = vmax.xlane.f32.xlu1 %v2380_v37 }
 0x68d   :  { %v4201_v39 = vadd.f32 %v3397_v38, %v4132_v62  ;;  %v2389_v47 = vsel %vm2352_vm2, %v4198_v52, -inf }
 0x68e   :  { %v2276_v42 = vpop.f32.mrf.mxu0  ;;  %2396 = vmax.xlane.f32.xlu0 %v2395_v41 }
 0x68f   :  { %v4206_v43 = vadd.f32 %v4132_v62, %v2276_v42  ;;  %v2398_v44 = vsel %vm2352_vm2, %v4201_v39, -inf }
 0x690   :  { %v3400_v45 = vpop.f32.mrf.mxu0  ;;  %2399 = vmax.xlane.f32.xlu1 %v2398_v44 }
 0x691   :  { %v4211_v46 = vadd.f32 %v3400_v45, %v4132_v62  ;;  %v2392_v49 = vsel %vm2352_vm2, %v4206_v43, -inf }
 0x692   :  { %v2289_v48 = vpop.f32.mrf.mxu0  ;;  %2390 = vmax.xlane.f32.xlu0 %v2389_v47 }
 0x693   :  { %v4218_v0 = vadd.f32 %v4132_v62, %v2289_v48  ;;  %v2407_v53 = vsel %vm2352_vm2, %v4211_v46, -inf }
 0x694   :  { %v3401_v50 = vpop.f32.mrf.mxu0  ;;  %2393 = vmax.xlane.f32.xlu1 %v2392_v49 }
 0x695   :  { %v4221_v51 = vadd.f32 %v3401_v50, %v4132_v62  ;;  %v2401_v59 = vsel %vm2352_vm2, %v4218_v0, -inf }
 0x696   :  { %v2292_v54 = vpop.f32.mrf.mxu0  ;;  %2408 = vmax.xlane.f32.xlu0 %v2407_v53 }
 0x697   :  { %v4226_v55 = vadd.f32 %v4132_v62, %v2292_v54  ;;  %v2410_v56 = vsel %vm2352_vm2, %v4221_v51, -inf }
 0x698   :  { %v3404_v57 = vpop.f32.mrf.mxu0  ;;  %2411 = vmax.xlane.f32.xlu1 %v2410_v56 }
 0x699   :  { %v4231_v58 = vadd.f32 %v3404_v57, %v4132_v62  ;;  %v2404_v61 = vsel %vm2352_vm2, %v4226_v55, -inf }
 0x69a   :  { %v2305_v60 = vpop.f32.mrf.mxu0  ;;  %2402 = vmax.xlane.f32.xlu0 %v2401_v59 }
 0x69b   :  { %v4238_v14 = vadd.f32 %v4132_v62, %v2305_v60  ;;  %v2419_v3 = vsel %vm2352_vm2, %v4231_v58, -inf }
 0x69c   :  { %v3405_v12 = vpop.f32.mrf.mxu0  ;;  %2405 = vmax.xlane.f32.xlu1 %v2404_v61 }
 0x69d   :  { %v4241_v2 = vadd.f32 %v3405_v12, %v4132_v62  ;;  %v2413_v11 = vsel %vm2352_vm2, %v4238_v14, -inf }
 0x69e   :  { %v2308_v5 = vpop.f32.mrf.mxu0  ;;  %2420 = vmax.xlane.f32.xlu0 %v2419_v3 }
 0x69f   :  { %v4246_v6 = vadd.f32 %v4132_v62, %v2308_v5  ;;  %v2422_v8 = vsel %vm2352_vm2, %v4241_v2, -inf }
 0x6a0   :  { %v3408_v9 = vpop.f32.mrf.mxu0  ;;  %2423 = vmax.xlane.f32.xlu1 %v2422_v8 }
 0x6a1   :  { %v4251_v24 = vadd.f32 %v3408_v9, %v4132_v62  ;;  %v2416_v16 = vsel %vm2352_vm2, %v4246_v6, -inf }
 0x6a2   :  { %v2321_v13 = vpop.f32.mrf.mxu0  ;;  %2414 = vmax.xlane.f32.xlu0 %v2413_v11 }
 0x6a3   :  { %v4258_v19 = vadd.f32 %v4132_v62, %v2321_v13  ;;  %v2431_v22 = vsel %vm2352_vm2, %v4251_v24, -inf }
 0x6a4   :  { %v3409_v17 = vpop.f32.mrf.mxu0  ;;  %2417 = vmax.xlane.f32.xlu1 %v2416_v16 }
 0x6a5   :  { %v4261_v20 = vadd.f32 %v3409_v17, %v4132_v62  ;;  %v2425_v30 = vsel %vm2352_vm2, %v4258_v19, -inf }
 0x6a6   :  { %v2324_v23 = vpop.f32.mrf.mxu0  ;;  %2432 = vmax.xlane.f32.xlu0 %v2431_v22 }
 0x6a7   :  { %v4266_v25 = vadd.f32 %v4132_v62, %v2324_v23  ;;  %v2434_v26 = vsel %vm2352_vm2, %v4261_v20, -inf }
 0x6a8   :  { %v3412_v29 = vpop.f32.mrf.mxu0  ;;  %2435 = vmax.xlane.f32.xlu1 %v2434_v26 }
 0x6a9   :  { %v2428_v35 = vsel %vm2352_vm2, %v4266_v25, -inf  ;;  %v4278_v37 = vadd.f32 %v3412_v29, %v4132_v62 }
 0x6aa   :  { %v2337_v32 = vpop.f32.mrf.mxu0  ;;  %2426 = vmax.xlane.f32.xlu0 %v2425_v30 }
 0x6ab   :  { %v4273_v33 = vadd.f32 %v4132_v62, %v2337_v32  ;;  %v2443_v47 = vsel %vm2352_vm2, %v4278_v37, -inf }
 0x6ac   :  { %v3413_v36 = vpop.f32.mrf.mxu0  ;;  %2429 = vmax.xlane.f32.xlu1 %v2428_v35 }
 0x6ad   :  { %v2437_v38 = vsel %vm2352_vm2, %v4273_v33, -inf  ;;  %v4286_v44 = vadd.f32 %v3413_v36, %v4132_v62 }
 0x6ae   :  { %v2340_v41 = vpop.f32.mrf.mxu0  ;;  %2438 = vmax.xlane.f32.xlu0 %v2437_v38 }
 0x6af   :  { %v4283_v42 = vadd.f32 %v4132_v62, %v2340_v41  ;;  %v2446_v48 = vsel %vm2352_vm2, %v4286_v44, -inf }
 0x6b1   :  { %v2440_v45 = vsel %vm2352_vm2, %v4283_v42, -inf }
 0x6b2   :  { %2441 = vmax.xlane.f32.xlu1 %v2440_v45  ;;  %2444 = vmax.xlane.f32.xlu0 %v2443_v47 }
 0x6b6   :  { %2447 = vmax.xlane.f32.xlu1 %v2446_v48 }
 0x6fd   :  { %v2361_v49 = vpop.xlane.xlu1 %2360 }
 0x6fe   :  { %v4295_v50 = vsub.f32 %v4135_v63, %v2361_v49 }
 0x6ff   :  { %v2355_v53 = vpop.xlane.xlu0 %2354 }
 0x700   :  { %v2485_v62 = vmul.f32 1.442695, %v4295_v50  ;;  %v4299_v54 = vsub.f32 %v4138_v1, %v2355_v53 }
 0x701   :  { %v2364_v56 = vpop.xlane.xlu1 %2363 }
 0x702   :  { %3450 = vpow2.f32 %v2485_v62  ;;  %v2481_v57 = vmul.f32 1.442695, %v4299_v54  ;;  %v4303_v59 = vsub.f32 %v4143_v4, %v2364_v56 }
 0x703   :  { %v2358_v60 = vpop.xlane.xlu0 %2357 }
 0x704   :  { %3452 = vpow2.f32 %v2481_v57  ;;  %v2487_v61 = vmul.f32 1.442695, %v4303_v59  ;;  %v4307_v63 = vsub.f32 %v4148_v7, %v2358_v60 }
 0x706   :  { %3454 = vpow2.f32 %v2487_v61  ;;  %v2483_v12 = vmul.f32 1.442695, %v4307_v63 }
 0x707   :  { %v2373_v3 = vpop.xlane.xlu0 %2372 }
 0x708   :  { %3456 = vpow2.f32 %v2483_v12  ;;  %v4311_v1 = vsub.f32 %v4153_v10, %v2373_v3 }
 0x709   :  { %v2376_v5 = vpop.xlane.xlu1 %2375 }
 0x70a   :  { %v2493_v8 = vmul.f32 1.442695, %v4311_v1  ;;  %v4315_v4 = vsub.f32 %v4161_v28, %v2376_v5 }
 0x70b   :  { %v2367_v9 = vpop.xlane.xlu0 %2366 }
 0x70c   :  { %3458 = vpow2.f32 %v2493_v8  ;;  %v2495_v11 = vmul.f32 1.442695, %v4315_v4  ;;  %v4319_v7 = vsub.f32 %v4158_v15, %v2367_v9 }
 0x70d   :  { %v2370_v13 = vpop.xlane.xlu1 %2369 }
 0x70e   :  { %3460 = vpow2.f32 %v2495_v11  ;;  %v2489_v16 = vmul.f32 1.442695, %v4319_v7  ;;  %v4323_v10 = vsub.f32 %v4166_v18, %v2370_v13 }
 0x70f   :  { %v3451_v17 = vpop.eup %3450  ;;  %v2385_v22 = vpop.xlane.xlu0 %2384 }
 0x710   :  { %3462 = vpow2.f32 %v2489_v16  ;;  %v2491_v28 = vmul.f32 1.442695, %v4323_v10  ;;  %v4327_v23 = vsub.f32 %v4171_v21, %v2385_v22  ;;  %v2551_v26 = vsel %vm2352_vm2, %v3451_v17, 0.0 }
 0x711   :  { %v3453_v29 = vpop.eup %3452  ;;  %v2388_v15 = vpop.xlane.xlu1 %2387  ;;  %2552 = vadd.xlane.f32.xlu0 %v2551_v26 }
 0x712   :  { %3464 = vpow2.f32 %v2491_v28  ;;  %v2501_v30 = vmul.f32 1.442695, %v4327_v23  ;;  %v4332_v32 = vsub.f32 %v4181_v27, %v2388_v15  ;;  %v2545_v36 = vsel %vm2352_vm2, %v3453_v29, 0.0 }
 0x713   :  { %v3455_v18 = vpop.eup %3454  ;;  %v2379_v35 = vpop.xlane.xlu0 %2378 }
 0x714   :  { %3466 = vpow2.f32 %v2501_v30  ;;  %v2503_v38 = vmul.f32 1.442695, %v4332_v32  ;;  %v4337_v21 = vsub.f32 %v4178_v40, %v2379_v35  ;;  %v2554_v41 = vsel %vm2352_vm2, %v3455_v18, 0.0 }
 0x715   :  { %v3457_v45 = vpop.eup %3456  ;;  %2555 = vadd.xlane.f32.xlu1 %v2554_v41  ;;  %v2382_v47 = vpop.xlane.xlu1 %2381  ;;  %2546 = vadd.xlane.f32.xlu0 %v2545_v36 }
 0x716   :  { %3468 = vpow2.f32 %v2503_v38  ;;  %v2497_v27 = vmul.f32 1.442695, %v4337_v21  ;;  %v4342_v48 = vsub.f32 %v4186_v31, %v2382_v47  ;;  %v2548_v40 = vsel %vm2352_vm2, %v3457_v45, 0.0 }
 0x717   :  { %v2397_v49 = vpop.xlane.xlu0 %2396 }
 0x718   :  { %3470 = vpow2.f32 %v2497_v27  ;;  %v2499_v53 = vmul.f32 1.442695, %v4342_v48  ;;  %v4346_v62 = vsub.f32 %v4191_v34, %v2397_v49 }
 0x719   :  { %v3459_v56 = vpop.eup %3458  ;;  %v2400_v57 = vpop.xlane.xlu1 %2399  ;;  %2549 = vadd.xlane.f32.xlu1 %v2548_v40 }
 0x71a   :  { %3472 = vpow2.f32 %v2499_v53  ;;  %v2509_v60 = vmul.f32 1.442695, %v4346_v62  ;;  %v4351_v61 = vsub.f32 %v4201_v39, %v2400_v57  ;;  %v2563_v31 = vsel %vm2352_vm2, %v3459_v56, 0.0 }
 0x71b   :  { %v3461_v12 = vpop.eup %3460  ;;  %2564 = vadd.xlane.f32.xlu0 %v2563_v31  ;;  %v2391_v3 = vpop.xlane.xlu0 %2390 }
 0x71c   :  { %3474 = vpow2.f32 %v2509_v60  ;;  %v2511_v34 = vmul.f32 1.442695, %v4351_v61  ;;  %v4356_v5 = vsub.f32 %v4198_v52, %v2391_v3  ;;  %v2566_v8 = vsel %vm2352_vm2, %v3461_v12, 0.0 }
 0x71d   :  { %v3463_v9 = vpop.eup %3462  ;;  %v2394_v11 = vpop.xlane.xlu1 %2393  ;;  %2567 = vadd.xlane.f32.xlu1 %v2566_v8 }
 0x71e   :  { %3476 = vpow2.f32 %v2511_v34  ;;  %v2505_v39 = vmul.f32 1.442695, %v4356_v5  ;;  %v4361_v13 = vsub.f32 %v4206_v43, %v2394_v11  ;;  %v2557_v16 = vsel %vm2352_vm2, %v3463_v9, 0.0 }
 0x71f   :  { %v3465_v17 = vpop.eup %3464  ;;  %2558 = vadd.xlane.f32.xlu0 %v2557_v16  ;;  %v2409_v22 = vpop.xlane.xlu0 %2408 }
 0x720   :  { %3478 = vpow2.f32 %v2505_v39  ;;  %v2507_v52 = vmul.f32 1.442695, %v4361_v13  ;;  %v4366_v28 = vsub.f32 %v4211_v46, %v2409_v22  ;;  %v2560_v26 = vsel %vm2352_vm2, %v3465_v17, 0.0 }
 0x721   :  { %v3467_v29 = vpop.eup %3466  ;;  %v2412_v15 = vpop.xlane.xlu1 %2411  ;;  %2561 = vadd.xlane.f32.xlu1 %v2560_v26 }
 0x722   :  { %3480 = vpow2.f32 %v2507_v52  ;;  %v2517_v43 = vmul.f32 1.442695, %v4366_v28  ;;  %v4371_v30 = vsub.f32 %v4221_v51, %v2412_v15  ;;  %v2575_v18 = vsel %vm2352_vm2, %v3467_v29, 0.0 }
 0x723   :  { %v3469_v35 = vpop.eup %3468  ;;  %2576 = vadd.xlane.f32.xlu0 %v2575_v18  ;;  %v2403_v36 = vpop.xlane.xlu0 %2402 }
 0x724   :  { %3482 = vpow2.f32 %v2517_v43  ;;  %v2519_v46 = vmul.f32 1.442695, %v4371_v30  ;;  %v4376_v38 = vsub.f32 %v4218_v0, %v2403_v36  ;;  %v2578_v41 = vsel %vm2352_vm2, %v3469_v35, 0.0 }
 0x725   :  { %v3471_v45 = vpop.eup %3470  ;;  %v2406_v47 = vpop.xlane.xlu1 %2405  ;;  %2579 = vadd.xlane.f32.xlu1 %v2578_v41 }
 0x726   :  { %3484 = vpow2.f32 %v2519_v46  ;;  %v2513_v51 = vmul.f32 1.442695, %v4376_v38  ;;  %v4381_v27 = vsub.f32 %v4226_v55, %v2406_v47  ;;  %v2569_v49 = vsel %vm2352_vm2, %v3471_v45, 0.0 }
 0x727   :  { %v3473_v53 = vpop.eup %3472  ;;  %2570 = vadd.xlane.f32.xlu0 %v2569_v49  ;;  %v2421_v40 = vpop.xlane.xlu0 %2420 }
 0x728   :  { %3486 = vpow2.f32 %v2513_v51  ;;  %v2515_v0 = vmul.f32 1.442695, %v4381_v27  ;;  %v4386_v56 = vsub.f32 %v4231_v58, %v2421_v40  ;;  %v2572_v57 = vsel %vm2352_vm2, %v3473_v53, 0.0 }
 0x729   :  { %v3475_v60 = vpop.eup %3474  ;;  %v2424_v31 = vpop.xlane.xlu1 %2423  ;;  %2573 = vadd.xlane.f32.xlu1 %v2572_v57 }
 0x72a   :  { %3488 = vpow2.f32 %v2515_v0  ;;  %v2525_v55 = vmul.f32 1.442695, %v4386_v56  ;;  %v4391_v12 = vsub.f32 %v4241_v2, %v2424_v31  ;;  %v2587_v3 = vsel %vm2352_vm2, %v3475_v60, 0.0 }
 0x72b   :  { %v3477_v34 = vpop.eup %3476  ;;  %2588 = vadd.xlane.f32.xlu0 %v2587_v3  ;;  %v2415_v8 = vpop.xlane.xlu0 %2414 }
 0x72c   :  { %3490 = vpow2.f32 %v2525_v55  ;;  %v2527_v58 = vmul.f32 1.442695, %v4391_v12  ;;  %v4396_v9 = vsub.f32 %v4238_v14, %v2415_v8  ;;  %v2590_v11 = vsel %vm2352_vm2, %v3477_v34, 0.0 }
 0x72d   :  { %v3479_v39 = vpop.eup %3478  ;;  %v2418_v16 = vpop.xlane.xlu1 %2417  ;;  %2591 = vadd.xlane.f32.xlu1 %v2590_v11 }
 0x72e   :  { %3492 = vpow2.f32 %v2527_v58  ;;  %v2521_v2 = vmul.f32 1.442695, %v4396_v9  ;;  %v4401_v17 = vsub.f32 %v4246_v6, %v2418_v16  ;;  %v2581_v22 = vsel %vm2352_vm2, %v3479_v39, 0.0 }
 0x72f   :  { %v3481_v52 = vpop.eup %3480  ;;  %2582 = vadd.xlane.f32.xlu0 %v2581_v22  ;;  %v2433_v26 = vpop.xlane.xlu0 %2432 }
 0x730   :  { %3494 = vpow2.f32 %v2521_v2  ;;  %v2523_v14 = vmul.f32 1.442695, %v4401_v17  ;;  %v4406_v29 = vsub.f32 %v4251_v24, %v2433_v26  ;;  %v2584_v15 = vsel %vm2352_vm2, %v3481_v52, 0.0 }
 0x731   :  { %v3483_v43 = vpop.eup %3482  ;;  %v2436_v18 = vpop.xlane.xlu1 %2435  ;;  %2585 = vadd.xlane.f32.xlu1 %v2584_v15 }
 0x732   :  { %3496 = vpow2.f32 %v2523_v14  ;;  %v2533_v6 = vmul.f32 1.442695, %v4406_v29  ;;  %v4411_v35 = vsub.f32 %v4261_v20, %v2436_v18  ;;  %v2599_v36 = vsel %vm2352_vm2, %v3483_v43, 0.0 }
 0x733   :  { %v3485_v46 = vpop.eup %3484  ;;  %2600 = vadd.xlane.f32.xlu0 %v2599_v36  ;;  %v2427_v41 = vpop.xlane.xlu0 %2426 }
 0x734   :  { %3498 = vpow2.f32 %v2533_v6  ;;  %v2535_v24 = vmul.f32 1.442695, %v4411_v35  ;;  %v4416_v45 = vsub.f32 %v4258_v19, %v2427_v41  ;;  %v2602_v47 = vsel %vm2352_vm2, %v3485_v46, 0.0 }
 0x735   :  { %v3487_v51 = vpop.eup %3486  ;;  %v2430_v49 = vpop.xlane.xlu1 %2429  ;;  %2603 = vadd.xlane.f32.xlu1 %v2602_v47 }
 0x736   :  { %3500 = vpow2.f32 %v2535_v24  ;;  %v2529_v20 = vmul.f32 1.442695, %v4416_v45  ;;  %v4421_v53 = vsub.f32 %v4266_v25, %v2430_v49  ;;  %v2593_v40 = vsel %vm2352_vm2, %v3487_v51, 0.0 }
 0x737   :  { %v3489_v0 = vpop.eup %3488  ;;  %2594 = vadd.xlane.f32.xlu0 %v2593_v40  ;;  %v2439_v57 = vpop.xlane.xlu0 %2438 }
 0x738   :  { %3502 = vpow2.f32 %v2529_v20  ;;  %v2531_v19 = vmul.f32 1.442695, %v4421_v53  ;;  %v4426_v60 = vsub.f32 %v4273_v33, %v2439_v57  ;;  %v2596_v31 = vsel %vm2352_vm2, %v3489_v0, 0.0 }
 0x739   :  { %v3491_v55 = vpop.eup %3490  ;;  %2597 = vadd.xlane.f32.xlu1 %v2596_v31 }
 0x73a   :  { %3504 = vpow2.f32 %v2531_v19  ;;  %v2537_v3 = vmul.f32 1.442695, %v4426_v60  ;;  %v2611_v25 = vsel %vm2352_vm2, %v3491_v55, 0.0 }
 0x73b   :  { %v3493_v34 = vpop.eup %3492  ;;  %v2442_v8 = vpop.xlane.xlu1 %2441  ;;  %2612 = vadd.xlane.f32.xlu0 %v2611_v25 }
 0x73c   :  { %v2445_v58 = vpop.xlane.xlu0 %2444  ;;  %3506 = vpow2.f32 %v2537_v3  ;;  %v4432_v11 = vsub.f32 %v4283_v42, %v2442_v8  ;;  %v2614_v39 = vsel %vm2352_vm2, %v3493_v34, 0.0 }
 0x73d   :  { %v4435_v33 = vsub.f32 %v4278_v37, %v2445_v58  ;;  %v3495_v16 = vpop.eup %3494  ;;  %2615 = vadd.xlane.f32.xlu1 %v2614_v39 }
 0x73e   :  { %v2539_v2 = vmul.f32 1.442695, %v4432_v11  ;;  %v2605_v52 = vsel %vm2352_vm2, %v3495_v16, 0.0 }
 0x73f   :  { %v2541_v22 = vmul.f32 1.442695, %v4435_v33  ;;  %v3497_v26 = vpop.eup %3496  ;;  %v2448_v14 = vpop.xlane.xlu1 %2447  ;;  %2606 = vadd.xlane.f32.xlu0 %v2605_v52 }
 0x740   :  { %3508 = vpow2.f32 %v2539_v2  ;;  %v4442_v42 = vsub.f32 %v4286_v44, %v2448_v14  ;;  %v2608_v37 = vsel %vm2352_vm2, %v3497_v26, 0.0 }
 0x741   :  { %v3499_v15 = vpop.eup %3498  ;;  %3510 = vpow2.f32 %v2541_v22  ;;  %2609 = vadd.xlane.f32.xlu1 %v2608_v37 }
 0x742   :  { %v2543_v43 = vmul.f32 1.442695, %v4442_v42  ;;  %v2623_v18 = vsel %vm2352_vm2, %v3499_v15, 0.0 }
 0x743   :  { %v3501_v6 = vpop.eup %3500  ;;  %2624 = vadd.xlane.f32.xlu0 %v2623_v18 }
 0x744   :  { %3512 = vpow2.f32 %v2543_v43  ;;  %v2626_v36 = vsel %vm2352_vm2, %v3501_v6, 0.0 }
 0x745   :  { %v3503_v46 = vpop.eup %3502  ;;  %2627 = vadd.xlane.f32.xlu1 %v2626_v36 }
 0x746   :  { %v2617_v41 = vsel %vm2352_vm2, %v3503_v46, 0.0 }
 0x747   :  { %v3505_v44 = vpop.eup %3504  ;;  %2618 = vadd.xlane.f32.xlu0 %v2617_v41 }
 0x748   :  { %v2620_v24 = vsel %vm2352_vm2, %v3505_v44, 0.0 }
 0x749   :  { %v3507_v47 = vpop.eup %3506  ;;  %2621 = vadd.xlane.f32.xlu1 %v2620_v24 }
 0x74a   :  { %v2629_v51 = vsel %vm2352_vm2, %v3507_v47, 0.0 }
 0x74b   :  { %2630 = vadd.xlane.f32.xlu0 %v2629_v51 }
 0x74d   :  { %v3509_v49 = vpop.eup %3508 }
 0x74e   :  { %v3511_v20 = vpop.eup %3510  ;;  %v2632_v40 = vsel %vm2352_vm2, %v3509_v49, 0.0 }
 0x74f   :  { %2633 = vadd.xlane.f32.xlu1 %v2632_v40  ;;  %v2635_v0 = vsel %vm2352_vm2, %v3511_v20, 0.0 }
 0x750   :  { %2636 = vadd.xlane.f32.xlu0 %v2635_v0 }
 0x751   :  { %v3513_v57 = vpop.eup %3512 }
 0x752   :  { %v2638_v19 = vsel %vm2352_vm2, %v3513_v57, 0.0 }
 0x753   :  { %2639 = vadd.xlane.f32.xlu1 %v2638_v19 }
 0x79a   :  { %v2553_v31 = vpop.xlane.xlu0 %2552 }
 0x79b   :  { %3514 = vlog2.f32 %v2553_v31 }
 0x79e   :  { %v2556_v55 = vpop.xlane.xlu1 %2555  ;;  %v2547_v3 = vpop.xlane.xlu0 %2546 }
 0x79f   :  { %3516 = vlog2.f32 %v2556_v55 }
 0x7a0   :  { %3518 = vlog2.f32 %v2547_v3 }
 0x7a2   :  { %v2550_v25 = vpop.xlane.xlu1 %2549 }
 0x7a3   :  { %3520 = vlog2.f32 %v2550_v25 }
 0x7a4   :  { %v2565_v34 = vpop.xlane.xlu0 %2564 }
 0x7a5   :  { %3522 = vlog2.f32 %v2565_v34 }
 0x7a6   :  { %v2568_v8 = vpop.xlane.xlu1 %2567 }
 0x7a7   :  { %3524 = vlog2.f32 %v2568_v8 }
 0x7a8   :  { %v3515_v58 = vpop.eup %3514  ;;  %v2559_v39 = vpop.xlane.xlu0 %2558 }
 0x7a9   :  { %v2646_v16 = vmul.f32 0.6931472, %v3515_v58  ;;  %3526 = vlog2.f32 %v2559_v39 }
 0x7aa   :  { %v2562_v2 = vpop.xlane.xlu1 %2561 }
 0x7ab   :  { %v2707_v22 = vsub.f32 %v4295_v50, %v2646_v16  ;;  %3528 = vlog2.f32 %v2562_v2 }
 0x7ac   :  { %v3517_v52 = vpop.eup %3516  ;;  %v2577_v26 = vpop.xlane.xlu0 %2576 }
 0x7ad   :  { %v3519_v14 = vpop.eup %3518  ;;  %2739 = vst.msk [vmem:[#allocation2 + $0x10] sm:$0xff] %vm2352_vm2, %v2707_v22  ;;  %v2648_v37 = vmul.f32 0.6931472, %v3517_v52  ;;  %3530 = vlog2.f32 %v2577_v26 }
 0x7ae   :  { %v2642_v15 = vmul.f32 0.6931472, %v3519_v14  ;;  %v2580_v43 = vpop.xlane.xlu1 %2579 }
 0x7af   :  { %v2708_v18 = vsub.f32 %v4303_v59, %v2648_v37  ;;  %3532 = vlog2.f32 %v2580_v43 }
 0x7b0   :  { %v3521_v6 = vpop.eup %3520  ;;  %v2705_v36 = vsub.f32 %v4299_v54, %v2642_v15  ;;  %v2571_v46 = vpop.xlane.xlu0 %2570 }
 0x7b1   :  { %2740 = vst.msk [vmem:[#allocation2 + $0x18] sm:$0xff] %vm2352_vm2, %v2708_v18  ;;  %v2644_v50 = vmul.f32 0.6931472, %v3521_v6  ;;  %3534 = vlog2.f32 %v2571_v46 }
 0x7b2   :  { %v3523_v41 = vpop.eup %3522  ;;  %2737 = vst.msk [vmem:[#allocation2] sm:$0xff] %vm2352_vm2, %v2705_v36  ;;  %v2574_v44 = vpop.xlane.xlu1 %2573 }
 0x7b3   :  { %v2706_v24 = vsub.f32 %v4307_v63, %v2644_v50  ;;  %v2654_v47 = vmul.f32 0.6931472, %v3523_v41  ;;  %3536 = vlog2.f32 %v2574_v44 }
 0x7b4   :  { %v3525_v51 = vpop.eup %3524  ;;  %v2589_v49 = vpop.xlane.xlu0 %2588 }
 0x7b5   :  { %2738 = vst.msk [vmem:[#allocation2 + $0x8] sm:$0xff] %vm2352_vm2, %v2706_v24  ;;  %v2711_v59 = vsub.f32 %v4311_v1, %v2654_v47  ;;  %v2656_v54 = vmul.f32 0.6931472, %v3525_v51  ;;  %3538 = vlog2.f32 %v2589_v49 }
 0x7b6   :  { %v3527_v20 = vpop.eup %3526  ;;  %v2592_v40 = vpop.xlane.xlu1 %2591 }
 0x7b7   :  { %2743 = vst.msk [vmem:[#allocation2 + $0x30] sm:$0xff] %vm2352_vm2, %v2711_v59  ;;  %v2712_v0 = vsub.f32 %v4315_v4, %v2656_v54  ;;  %v2650_v57 = vmul.f32 0.6931472, %v3527_v20  ;;  %3540 = vlog2.f32 %v2592_v40 }
 0x7b8   :  { %v3529_v19 = vpop.eup %3528  ;;  %v2583_v63 = vpop.xlane.xlu0 %2582 }
 0x7b9   :  { %2744 = vst.msk [vmem:[#allocation2 + $0x38] sm:$0xff] %vm2352_vm2, %v2712_v0  ;;  %v2709_v31 = vsub.f32 %v4319_v7, %v2650_v57  ;;  %v2652_v55 = vmul.f32 0.6931472, %v3529_v19  ;;  %3542 = vlog2.f32 %v2583_v63 }
 0x7ba   :  { %v3531_v3 = vpop.eup %3530  ;;  %v2586_v1 = vpop.xlane.xlu1 %2585 }
 0x7bb   :  { %2741 = vst.msk [vmem:[#allocation2 + $0x20] sm:$0xff] %vm2352_vm2, %v2709_v31  ;;  %v2710_v25 = vsub.f32 %v4323_v10, %v2652_v55  ;;  %v2662_v34 = vmul.f32 0.6931472, %v3531_v3  ;;  %3544 = vlog2.f32 %v2586_v1 }
 0x7bc   :  { %v3533_v8 = vpop.eup %3532  ;;  %v2601_v4 = vpop.xlane.xlu0 %2600 }
 0x7bd   :  { %2742 = vst.msk [vmem:[#allocation2 + $0x28] sm:$0xff] %vm2352_vm2, %v2710_v25  ;;  %v2715_v58 = vsub.f32 %v4327_v23, %v2662_v34  ;;  %v2664_v39 = vmul.f32 0.6931472, %v3533_v8  ;;  %3546 = vlog2.f32 %v2601_v4 }
 0x7be   :  { %v3535_v16 = vpop.eup %3534  ;;  %v2604_v7 = vpop.xlane.xlu1 %2603 }
 0x7bf   :  { %2747 = vst.msk [vmem:[#allocation2 + $0x50] sm:$0xff] %vm2352_vm2, %v2715_v58  ;;  %v2716_v2 = vsub.f32 %v4332_v32, %v2664_v39  ;;  %v2658_v22 = vmul.f32 0.6931472, %v3535_v16  ;;  %3548 = vlog2.f32 %v2604_v7 }
 0x7c0   :  { %v3537_v52 = vpop.eup %3536  ;;  %v2595_v10 = vpop.xlane.xlu0 %2594 }
 0x7c1   :  { %2748 = vst.msk [vmem:[#allocation2 + $0x58] sm:$0xff] %vm2352_vm2, %v2716_v2  ;;  %v2713_v26 = vsub.f32 %v4337_v21, %v2658_v22  ;;  %v2660_v14 = vmul.f32 0.6931472, %v3537_v52  ;;  %3550 = vlog2.f32 %v2595_v10 }
 0x7c2   :  { %v3539_v37 = vpop.eup %3538  ;;  %v2598_v23 = vpop.xlane.xlu1 %2597 }
 0x7c3   :  { %2745 = vst.msk [vmem:[#allocation2 + $0x40] sm:$0xff] %vm2352_vm2, %v2713_v26  ;;  %v2714_v15 = vsub.f32 %v4342_v48, %v2660_v14  ;;  %v2670_v43 = vmul.f32 0.6931472, %v3539_v37  ;;  %3552 = vlog2.f32 %v2598_v23 }
 0x7c4   :  { %v3541_v18 = vpop.eup %3540  ;;  %v2613_v32 = vpop.xlane.xlu0 %2612 }
 0x7c5   :  { %2746 = vst.msk [vmem:[#allocation2 + $0x48] sm:$0xff] %vm2352_vm2, %v2714_v15  ;;  %v2719_v6 = vsub.f32 %v4346_v62, %v2670_v43  ;;  %v2672_v36 = vmul.f32 0.6931472, %v3541_v18  ;;  %3554 = vlog2.f32 %v2613_v32 }
 0x7c6   :  { %v3543_v46 = vpop.eup %3542  ;;  %v2616_v21 = vpop.xlane.xlu1 %2615 }
 0x7c7   :  { %2751 = vst.msk [vmem:[#allocation2 + $0x70] sm:$0xff] %vm2352_vm2, %v2719_v6  ;;  %v2720_v50 = vsub.f32 %v4351_v61, %v2672_v36  ;;  %v2666_v41 = vmul.f32 0.6931472, %v3543_v46  ;;  %3556 = vlog2.f32 %v2616_v21 }
 0x7c8   :  { %v3545_v44 = vpop.eup %3544  ;;  %v2607_v48 = vpop.xlane.xlu0 %2606 }
 0x7c9   :  { %2752 = vst.msk [vmem:[#allocation2 + $0x78] sm:$0xff] %vm2352_vm2, %v2720_v50  ;;  %v2717_v24 = vsub.f32 %v4356_v5, %v2666_v41  ;;  %v2668_v47 = vmul.f32 0.6931472, %v3545_v44  ;;  %3558 = vlog2.f32 %v2607_v48 }
 0x7ca   :  { %v3547_v51 = vpop.eup %3546  ;;  %v2610_v62 = vpop.xlane.xlu1 %2609 }
 0x7cb   :  { %2749 = vst.msk [vmem:[#allocation2 + $0x60] sm:$0xff] %vm2352_vm2, %v2717_v24  ;;  %v2718_v49 = vsub.f32 %v4361_v13, %v2668_v47  ;;  %v2678_v59 = vmul.f32 0.6931472, %v3547_v51  ;;  %3560 = vlog2.f32 %v2610_v62 }
 0x7cc   :  { %v3549_v54 = vpop.eup %3548  ;;  %v2625_v61 = vpop.xlane.xlu0 %2624 }
 0x7cd   :  { %2750 = vst.msk [vmem:[#allocation2 + $0x68] sm:$0xff] %vm2352_vm2, %v2718_v49  ;;  %v2723_v20 = vsub.f32 %v4366_v28, %v2678_v59  ;;  %v2680_v40 = vmul.f32 0.6931472, %v3549_v54  ;;  %3562 = vlog2.f32 %v2625_v61 }
 0x7ce   :  { %v3551_v0 = vpop.eup %3550  ;;  %v2628_v5 = vpop.xlane.xlu1 %2627 }
 0x7cf   :  { %2755 = vst.msk [vmem:[#allocation2 + $0x90] sm:$0xff] %vm2352_vm2, %v2723_v20  ;;  %v2724_v57 = vsub.f32 %v4371_v30, %v2680_v40  ;;  %v2674_v19 = vmul.f32 0.6931472, %v3551_v0  ;;  %3564 = vlog2.f32 %v2628_v5 }
 0x7d0   :  { %v3553_v63 = vpop.eup %3552  ;;  %v2619_v13 = vpop.xlane.xlu0 %2618 }
 0x7d1   :  { %2756 = vst.msk [vmem:[#allocation2 + $0x98] sm:$0xff] %vm2352_vm2, %v2724_v57  ;;  %v2721_v31 = vsub.f32 %v4376_v38, %v2674_v19  ;;  %v2676_v55 = vmul.f32 0.6931472, %v3553_v63  ;;  %3566 = vlog2.f32 %v2619_v13 }
 0x7d2   :  { %v3555_v3 = vpop.eup %3554  ;;  %v2622_v28 = vpop.xlane.xlu1 %2621 }
 0x7d3   :  { %2753 = vst.msk [vmem:[#allocation2 + $0x80] sm:$0xff] %vm2352_vm2, %v2721_v31  ;;  %v2722_v1 = vsub.f32 %v4381_v27, %v2676_v55  ;;  %v2686_v25 = vmul.f32 0.6931472, %v3555_v3  ;;  %3568 = vlog2.f32 %v2622_v28 }
 0x7d4   :  { %v3557_v34 = vpop.eup %3556  ;;  %v2631_v30 = vpop.xlane.xlu0 %2630 }
 0x7d5   :  { %2754 = vst.msk [vmem:[#allocation2 + $0x88] sm:$0xff] %vm2352_vm2, %v2722_v1  ;;  %v2727_v8 = vsub.f32 %v4386_v56, %v2686_v25  ;;  %v2688_v4 = vmul.f32 0.6931472, %v3557_v34  ;;  %3570 = vlog2.f32 %v2631_v30 }
 0x7d6   :  { %v3559_v58 = vpop.eup %3558 }
 0x7d7   :  { %2759 = vst.msk [vmem:[#allocation2 + $0xb0] sm:$0xff] %vm2352_vm2, %v2727_v8  ;;  %v2728_v38 = vsub.f32 %v4391_v12, %v2688_v4  ;;  %v2682_v39 = vmul.f32 0.6931472, %v3559_v58 }
 0x7d8   :  { %v3561_v16 = vpop.eup %3560  ;;  %v2634_v7 = vpop.xlane.xlu1 %2633 }
 0x7d9   :  { %2760 = vst.msk [vmem:[#allocation2 + $0xb8] sm:$0xff] %vm2352_vm2, %v2728_v38  ;;  %v2725_v27 = vsub.f32 %v4396_v9, %v2682_v39  ;;  %v2684_v2 = vmul.f32 0.6931472, %v3561_v16  ;;  %3572 = vlog2.f32 %v2634_v7  ;;  %v2637_v22 = vpop.xlane.xlu0 %2636 }
 0x7da   :  { %v3563_v52 = vpop.eup %3562  ;;  %3574 = vlog2.f32 %v2637_v22 }
 0x7db   :  { %2757 = vst.msk [vmem:[#allocation2 + $0xa0] sm:$0xff] %vm2352_vm2, %v2725_v27  ;;  %v2726_v56 = vsub.f32 %v4401_v17, %v2684_v2  ;;  %v2694_v10 = vmul.f32 0.6931472, %v3563_v52 }
 0x7dc   :  { %v3565_v26 = vpop.eup %3564  ;;  %v2640_v14 = vpop.xlane.xlu1 %2639 }
 0x7dd   :  { %2758 = vst.msk [vmem:[#allocation2 + $0xa8] sm:$0xff] %vm2352_vm2, %v2726_v56  ;;  %v2731_v12 = vsub.f32 %v4406_v29, %v2694_v10  ;;  %v2696_v37 = vmul.f32 0.6931472, %v3565_v26  ;;  %3576 = vlog2.f32 %v2640_v14 }
 0x7de   :  { %v3567_v23 = vpop.eup %3566 }
 0x7df   :  { %2763 = vst.msk [vmem:[#allocation2 + $0xd0] sm:$0xff] %vm2352_vm2, %v2731_v12  ;;  %v2732_v9 = vsub.f32 %v4411_v35, %v2696_v37  ;;  %v2690_v15 = vmul.f32 0.6931472, %v3567_v23 }
 0x7e0   :  { %v3569_v43 = vpop.eup %3568 }
 0x7e1   :  { %2764 = vst.msk [vmem:[#allocation2 + $0xd8] sm:$0xff] %vm2352_vm2, %v2732_v9  ;;  %v2729_v17 = vsub.f32 %v4416_v45, %v2690_v15  ;;  %v2692_v18 = vmul.f32 0.6931472, %v3569_v43 }
 0x7e2   :  { %v3571_v32 = vpop.eup %3570 }
 0x7e3   :  { %2761 = vst.msk [vmem:[#allocation2 + $0xc0] sm:$0xff] %vm2352_vm2, %v2729_v17  ;;  %v2730_v6 = vsub.f32 %v4421_v53, %v2692_v18  ;;  %v2698_v29 = vmul.f32 0.6931472, %v3571_v32 }
 0x7e5   :  { %2762 = vst.msk [vmem:[#allocation2 + $0xc8] sm:$0xff] %vm2352_vm2, %v2730_v6  ;;  %v2733_v36 = vsub.f32 %v4426_v60, %v2698_v29 }
 0x7e6   :  { %v3573_v46 = vpop.eup %3572 }
 0x7e7   :  { %v3575_v21 = vpop.eup %3574  ;;  %2765 = vst.msk [vmem:[#allocation2 + $0xe0] sm:$0xff] %vm2352_vm2, %v2733_v36  ;;  %v2700_v35 = vmul.f32 0.6931472, %v3573_v46 }
 0x7e8   :  { %v2702_v50 = vmul.f32 0.6931472, %v3575_v21 }
 0x7e9   :  { %v2734_v41 = vsub.f32 %v4432_v11, %v2700_v35 }
 0x7ea   :  { %v3577_v45 = vpop.eup %3576  ;;  %v2735_v44 = vsub.f32 %v4435_v33, %v2702_v50 }
 0x7eb   :  { %2766 = vst.msk [vmem:[#allocation2 + $0xe8] sm:$0xff] %vm2352_vm2, %v2734_v41  ;;  %v2704_v48 = vmul.f32 0.6931472, %v3577_v45 }
 0x7ec   :  { %2767 = vst.msk [vmem:[#allocation2 + $0xf0] sm:$0xff] %vm2352_vm2, %v2735_v44 }
 0x7ed   :  { %v2736_v53 = vsub.f32 %v4442_v42, %v2704_v48 }
 0x7ef   :  { %2768 = vst.msk [vmem:[#allocation2 + $0xf8] sm:$0xff] %vm2352_vm2, %v2736_v53 }
 0x7f0   :  { %2773 = vsyncadd [#allocation3], 2560  ;;  %s3600_s6 = smov [#allocation2]  }
 0x7f1   :  { %s2774_s27 = sshll.u32 %s3600_s6, 4  ;;  %s2775_s27 = int_to_ptr.vmem [resolvable:$true] %s2774_s27 }
 0x7f2   :  { %s3578_s28 = scalar_lea.vmem %s2775_s27, 1536  ;;  %s3582_s29 = scalar_lea.vmem %s2775_s27, 4096 }
 0x7f3   :  { %p3579_p0 = scmp.ne.s32.totalorder %s2775_s27, %s3578_s28  ;;  %p3583_p1 = scmp.lt.s32.totalorder %s2775_s27, %s2775_s27 }
 0x7f4   :  { %p3584_p2 = scmp.lt.s32.totalorder %s3582_s29, %s3578_s28 }
 0x7f6   :  { %p3585_p3 = por %p3584_p2, %p3583_p1 }
 0x7f8   :  { %p3586_p4 = pnand %p3585_p3, %p3579_p0 }
 0x7fa   :  { %3589 = shalt.err (!%p3586_p4)
}
 0x7fb   :  { %s3601_s30 = smov 128   ;;  %s3602_s8 = smov 8  }
 0x7fc   :  { %2780 = dma.vmem_to_hbm [thread:$0]  %s2775_s27, 1536, %s4528_s7, [#allocation3], %s3601_s30, %s3601_s30, %s3602_s8  }
 0x7fd   :  { %3598 = dma.done.wait [#allocation3], 4096  }
 0x7fe   :  { %3599 = vsyncadd [#allocation3], 4294963200 }
 0x7ff   :  { %2784 = vsyncpa [#allocation3], 1 }

</bundles_post_ra>
